<compile_context>
chip_gen: v5e
topology: v5e:2x2
jax: 0.10.0
libtpu: 0.0.40
codegen_flags: <defaults>
</compile_context>

<pallas_src>
import jax
import jax.numpy as jnp
import numpy as np
from jax.experimental import pallas as pl
from jax.experimental.pallas import tpu as pltpu

LEAKY_SLOPE = 0.01   # nn.LeakyReLU() default
BN_EPS = 1e-5        # nn.BatchNorm2d default

N_TAP = 9            # 3x3 conv taps
N_CORNER = 4         # 2x2 max-pool corners
C_OUT = 6            # conv output channels (module spec)
N_HEAD = 2           # fc output features  (module spec)

# Row layout of the merged parameter array `wparams` (shape (23, S)):
FCW0_ROW = 0         # rows  0..5  : fc weight, head 0, per conv channel (C, S)
FCW1_ROW = 8         # rows  8..13 : fc weight, head 1 (8-aligned slice start)
CONV_ROW = 16        # rows 16..21 : lanes 0..8 = BN-scaled conv taps, lane 9 = shift
FCB_ROW = 22         # row  22     : lanes 0..1 = fc bias
WPARAM_ROWS = 23


# ---------------- Fused Pallas kernel ----------------

def fused_net_kernel(patches_ref, wp_ref, out_ref):
    """conv(3x3, s=2, p=1) + BN + LeakyReLU + maxpool(2,2) + Linear, fused.

    patches_ref: (B, 36, S)  im2col rows, row = 9*corner + tap; S = Hp*Wp (lanes).
    wp_ref:      (23, S)     merged parameters (row layout above).
    out_ref:     (B, 2)      network output.
    """
    batch = patches_ref.shape[0]
    C = C_OUT

    conv_blk = wp_ref[CONV_ROW:CONV_ROW + C, 0:N_TAP + 1]    # (C, 10): taps + shift
    shift = conv_blk[:, N_TAP:N_TAP + 1]                     # (C, 1)
    fcw0 = wp_ref[FCW0_ROW:FCW0_ROW + C, :]                  # (C, S)
    fcw1 = wp_ref[FCW1_ROW:FCW1_ROW + C, :]                  # (C, S)
    fcb = wp_ref[FCB_ROW:FCB_ROW + 1, 0:N_HEAD]              # (1, 2)

    rows = []
    for b in range(batch):
        # raw (BN-scaled, bias-free) conv for the 4 pool corners, max as we go.
        pooled = None
        for q in range(N_CORNER):
            base = N_TAP * q
            acc = conv_blk[:, 0:1] * patches_ref[b, base:base + 1, :]
            for k in range(1, N_TAP):
                acc = acc + conv_blk[:, k:k + 1] * patches_ref[b, base + k:base + k + 1, :]
            pooled = acc if pooled is None else jnp.maximum(pooled, acc)
        # Shift + LeakyReLU hoisted after the max (exact: monotone per channel).
        y = pooled + shift
        y = jnp.maximum(y, LEAKY_SLOPE * y)
        # fc: VPU multiply, lane reduce, sublane reduce, per head.
        t0 = jnp.sum(jnp.sum(y * fcw0, axis=1, keepdims=True), axis=0, keepdims=True)
        t1 = jnp.sum(jnp.sum(y * fcw1, axis=1, keepdims=True), axis=0, keepdims=True)
        rows.append(jnp.concatenate([t0, t1], axis=1))        # (1, 2)
    out_ref[...] = jnp.concatenate(rows, axis=0) + fcb         # one full store


# ---------------- Wrapper (minimal glue in plain JAX) ----------------

def custom_net_forward(x, params):
    """x: (B, 1, H, W) float32 NCHW (PyTorch convention)."""
    B, Cin, H, W = x.shape
    assert Cin == 1

    conv_w = params["conv_w"]          # (6, 1, 3, 3)  OIHW
    conv_b = params["conv_b"]          # (6,)
    gamma, beta = params["bn_gamma"], params["bn_beta"]
    mean, var = params["bn_mean"], params["bn_var"]
    fc_w, fc_b = params["fc_w"], params["fc_b"]   # (2, 2100), (2,)

    C = conv_w.shape[0]
    n_out = fc_w.shape[0]
    assert C == C_OUT and n_out == N_HEAD
    # Conv2d(k=3, stride=2, pad=1) output dims, then MaxPool2d(2,2) (floor).
    Ho = (H + 2 - 3) // 2 + 1
    Wo = (W + 2 - 3) // 2 + 1
    Hp, Wp = Ho // 2, Wo // 2
    S = Hp * Wp
    assert C * S == fc_w.shape[1], "fc in_features must equal pooled feature count"

    # --- im2col, packed lane-dense as (B, 36, S); row = 9*(2*py+px) + 3*di+dj.
    # Conv output (2*hp+py, 2*wp+px) reads padded input (4*hp+2*py+di, 4*wp+2*px+dj).
    # TODO(synk): fully in-kernel im2col (passing only the ~46 KB padded input)
    # needs lane-strided loads / in-kernel lane reshapes; kept in the wrapper
    # with an allow_input_fusion hint instead.
    xp = jnp.pad(x[:, 0], ((0, 0), (1, 1), (1, 1)))            # (B, H+2, W+2)
    tap_rows = []
    for py in range(2):
        for px in range(2):
            for di in range(3):
                for dj in range(3):
                    r0, c0 = 2 * py + di, 2 * px + dj
                    tap_rows.append(
                        xp[:, r0:r0 + 4 * (Hp - 1) + 1:4,
                              c0:c0 + 4 * (Wp - 1) + 1:4].reshape(B, S))
    patches = jnp.stack(tap_rows, axis=1).astype(jnp.float32)  # (B, 36, S)

    # --- fold BN (running stats) + conv bias; merge ALL params into one array.
    scale = gamma / jnp.sqrt(var + BN_EPS)                                # (C,)
    w_scaled = (conv_w.reshape(C, 9) * scale[:, None]).astype(jnp.float32)  # (C, 9)
    shift = ((conv_b - mean) * scale + beta).astype(jnp.float32)          # (C,)
    # Pooled layout (c, hp*Wp+wp) == torch's NCHW flatten order: reshape only.
    fcw = fc_w.reshape(n_out, C, S).astype(jnp.float32)                   # (2, C, S)

    wparams = jnp.zeros((WPARAM_ROWS, S), jnp.float32)
    wparams = wparams.at[FCW0_ROW:FCW0_ROW + C, :].set(fcw[0])
    wparams = wparams.at[FCW1_ROW:FCW1_ROW + C, :].set(fcw[1])
    wparams = wparams.at[CONV_ROW:CONV_ROW + C, 0:N_TAP].set(w_scaled)
    wparams = wparams.at[CONV_ROW:CONV_ROW + C, N_TAP].set(shift)
    wparams = wparams.at[FCB_ROW, 0:n_out].set(fc_b.astype(jnp.float32))

    # Dropout(p=0.25) is identity in eval/inference mode.
    # TODO(synk): training-mode dropout mask / batch-statistic BN not implemented.

    vmem = pl.BlockSpec(memory_space=pltpu.MemorySpace.VMEM)
    out = pl.pallas_call(
        fused_net_kernel,
        out_shape=jax.ShapeDtypeStruct((B, n_out), jnp.float32),
        in_specs=[vmem, vmem],
        out_specs=vmem,
        compiler_params=pltpu.CompilerParams(
            allow_input_fusion=[True, False]),   # let XLA fuse im2col into input
    )(patches, wparams)
    return out


# ---------------- Pure-JAX reference for validation ----------------

def reference_forward(x, params):
    prec = jax.lax.Precision.HIGHEST
    conv = jax.lax.conv_general_dilated(
        x, params["conv_w"], window_strides=(2, 2), padding=((1, 1), (1, 1)),
        dimension_numbers=("NCHW", "OIHW", "NCHW"), precision=prec)
    conv = conv + params["conv_b"].reshape(1, -1, 1, 1)
    scale = params["bn_gamma"] / jnp.sqrt(params["bn_var"] + BN_EPS)
    y = (conv - params["bn_mean"].reshape(1, -1, 1, 1)) * scale.reshape(1, -1, 1, 1) \
        + params["bn_beta"].reshape(1, -1, 1, 1)
    y = jnp.where(y >= 0, y, LEAKY_SLOPE * y)
    B, C, Ho, Wo = y.shape
    y = y.reshape(B, C, Ho // 2, 2, Wo // 2, 2).max(axis=(3, 5))
    flat = y.reshape(B, -1)
    return jnp.dot(flat, params["fc_w"].T, precision=prec) + params["fc_b"]


if __name__ == "__main__":
    key = jax.random.PRNGKey(0)
    keys = jax.random.split(key, 9)

    # fc expects 2100 = 6 * 25 * 14  ->  input spatial 100 x 56, Cin = 1.
    B, H, W = 2, 100, 56

    params = dict(
        conv_w=0.2 * jax.random.normal(keys[0], (6, 1, 3, 3), jnp.float32),
        conv_b=0.1 * jax.random.normal(keys[1], (6,), jnp.float32),
        bn_gamma=1.0 + 0.1 * jax.random.normal(keys[2], (6,), jnp.float32),
        bn_beta=0.1 * jax.random.normal(keys[3], (6,), jnp.float32),
        bn_mean=0.1 * jax.random.normal(keys[4], (6,), jnp.float32),
        bn_var=0.5 + 0.5 * jnp.abs(jax.random.normal(keys[5], (6,), jnp.float32)),
        fc_w=0.02 * jax.random.normal(keys[6], (2, 2100), jnp.float32),
        fc_b=0.1 * jax.random.normal(keys[7], (2,), jnp.float32),
    )
    x = jax.random.normal(keys[8], (B, 1, H, W), jnp.float32)

    fwd = jax.jit(custom_net_forward)
    out = jax.block_until_ready(fwd(x, params))

    ref = reference_forward(x, params)
    assert out.shape == (B, 2), out.shape
    if not np.allclose(np.asarray(out), np.asarray(ref), rtol=5e-4, atol=5e-4):
        raise SystemExit(f"mismatch vs reference:\n{out}\nvs\n{ref}")
    print("KERNEL_OK")
</pallas_src>

<mosaic_0001>
module attributes {stable_mosaic.version = 11 : i64} {
  func.func @fused_net_kernel(%arg0: memref<2x36x350xf32, #tpu.memory_space<vmem>>, %arg1: memref<23x350xf32, #tpu.memory_space<vmem>>, %arg2: memref<2x2xf32, #tpu.memory_space<vmem>>) attributes {dimension_semantics = [], scalar_prefetch = 0 : i64, scratch_operands = 0 : i64, tpu.core_type = #tpu.core_type<tc>} {
    %c16 = arith.constant 16 : index
    %c0 = arith.constant 0 : index
    %0 = vector.load %arg1[%c16, %c0] : memref<23x350xf32, #tpu.memory_space<vmem>>, vector<6x10xf32>
    %1 = vector.extract_strided_slice %0 {offsets = [0, 9], sizes = [6, 1], strides = [1, 1]} : vector<6x10xf32> to vector<6x1xf32>
    %c0_0 = arith.constant 0 : index
    %c0_1 = arith.constant 0 : index
    %2 = vector.load %arg1[%c0_0, %c0_1] : memref<23x350xf32, #tpu.memory_space<vmem>>, vector<6x350xf32>
    %c8 = arith.constant 8 : index
    %c0_2 = arith.constant 0 : index
    %3 = vector.load %arg1[%c8, %c0_2] : memref<23x350xf32, #tpu.memory_space<vmem>>, vector<6x350xf32>
    %c22 = arith.constant 22 : index
    %c0_3 = arith.constant 0 : index
    %4 = vector.load %arg1[%c22, %c0_3] : memref<23x350xf32, #tpu.memory_space<vmem>>, vector<1x2xf32>
    %5 = vector.extract_strided_slice %0 {offsets = [0, 0], sizes = [6, 1], strides = [1, 1]} : vector<6x10xf32> to vector<6x1xf32>
    %c0_4 = arith.constant 0 : index
    %c0_5 = arith.constant 0 : index
    %c0_6 = arith.constant 0 : index
    %6 = vector.load %arg0[%c0_4, %c0_5, %c0_6] : memref<2x36x350xf32, #tpu.memory_space<vmem>>, vector<1x1x350xf32>
    %7 = vector.shape_cast %6 : vector<1x1x350xf32> to vector<1x350xf32>
    %8 = vector.broadcast %5 : vector<6x1xf32> to vector<6x350xf32>
    %9 = vector.broadcast %7 : vector<1x350xf32> to vector<6x350xf32>
    %10 = arith.mulf %8, %9 : vector<6x350xf32>
    %11 = vector.extract_strided_slice %0 {offsets = [0, 1], sizes = [6, 1], strides = [1, 1]} : vector<6x10xf32> to vector<6x1xf32>
    %c0_7 = arith.constant 0 : index
    %c1 = arith.constant 1 : index
    %c0_8 = arith.constant 0 : index
    %12 = vector.load %arg0[%c0_7, %c1, %c0_8] : memref<2x36x350xf32, #tpu.memory_space<vmem>>, vector<1x1x350xf32>
    %13 = vector.shape_cast %12 : vector<1x1x350xf32> to vector<1x350xf32>
    %14 = vector.broadcast %11 : vector<6x1xf32> to vector<6x350xf32>
    %15 = vector.broadcast %13 : vector<1x350xf32> to vector<6x350xf32>
    %16 = arith.mulf %14, %15 : vector<6x350xf32>
    %17 = arith.addf %10, %16 : vector<6x350xf32>
    %18 = vector.extract_strided_slice %0 {offsets = [0, 2], sizes = [6, 1], strides = [1, 1]} : vector<6x10xf32> to vector<6x1xf32>
    %c0_9 = arith.constant 0 : index
    %c2 = arith.constant 2 : index
    %c0_10 = arith.constant 0 : index
    %19 = vector.load %arg0[%c0_9, %c2, %c0_10] : memref<2x36x350xf32, #tpu.memory_space<vmem>>, vector<1x1x350xf32>
    %20 = vector.shape_cast %19 : vector<1x1x350xf32> to vector<1x350xf32>
    %21 = vector.broadcast %18 : vector<6x1xf32> to vector<6x350xf32>
    %22 = vector.broadcast %20 : vector<1x350xf32> to vector<6x350xf32>
    %23 = arith.mulf %21, %22 : vector<6x350xf32>
    %24 = arith.addf %17, %23 : vector<6x350xf32>
    %25 = vector.extract_strided_slice %0 {offsets = [0, 3], sizes = [6, 1], strides = [1, 1]} : vector<6x10xf32> to vector<6x1xf32>
    %c0_11 = arith.constant 0 : index
    %c3 = arith.constant 3 : index
    %c0_12 = arith.constant 0 : index
    %26 = vector.load %arg0[%c0_11, %c3, %c0_12] : memref<2x36x350xf32, #tpu.memory_space<vmem>>, vector<1x1x350xf32>
    %27 = vector.shape_cast %26 : vector<1x1x350xf32> to vector<1x350xf32>
    %28 = vector.broadcast %25 : vector<6x1xf32> to vector<6x350xf32>
    %29 = vector.broadcast %27 : vector<1x350xf32> to vector<6x350xf32>
    %30 = arith.mulf %28, %29 : vector<6x350xf32>
    %31 = arith.addf %24, %30 : vector<6x350xf32>
    %32 = vector.extract_strided_slice %0 {offsets = [0, 4], sizes = [6, 1], strides = [1, 1]} : vector<6x10xf32> to vector<6x1xf32>
    %c0_13 = arith.constant 0 : index
    %c4 = arith.constant 4 : index
    %c0_14 = arith.constant 0 : index
    %33 = vector.load %arg0[%c0_13, %c4, %c0_14] : memref<2x36x350xf32, #tpu.memory_space<vmem>>, vector<1x1x350xf32>
    %34 = vector.shape_cast %33 : vector<1x1x350xf32> to vector<1x350xf32>
    %35 = vector.broadcast %32 : vector<6x1xf32> to vector<6x350xf32>
    %36 = vector.broadcast %34 : vector<1x350xf32> to vector<6x350xf32>
    %37 = arith.mulf %35, %36 : vector<6x350xf32>
    %38 = arith.addf %31, %37 : vector<6x350xf32>
    %39 = vector.extract_strided_slice %0 {offsets = [0, 5], sizes = [6, 1], strides = [1, 1]} : vector<6x10xf32> to vector<6x1xf32>
    %c0_15 = arith.constant 0 : index
    %c5 = arith.constant 5 : index
    %c0_16 = arith.constant 0 : index
    %40 = vector.load %arg0[%c0_15, %c5, %c0_16] : memref<2x36x350xf32, #tpu.memory_space<vmem>>, vector<1x1x350xf32>
    %41 = vector.shape_cast %40 : vector<1x1x350xf32> to vector<1x350xf32>
    %42 = vector.broadcast %39 : vector<6x1xf32> to vector<6x350xf32>
    %43 = vector.broadcast %41 : vector<1x350xf32> to vector<6x350xf32>
    %44 = arith.mulf %42, %43 : vector<6x350xf32>
    %45 = arith.addf %38, %44 : vector<6x350xf32>
    %46 = vector.extract_strided_slice %0 {offsets = [0, 6], sizes = [6, 1], strides = [1, 1]} : vector<6x10xf32> to vector<6x1xf32>
    %c0_17 = arith.constant 0 : index
    %c6 = arith.constant 6 : index
    %c0_18 = arith.constant 0 : index
    %47 = vector.load %arg0[%c0_17, %c6, %c0_18] : memref<2x36x350xf32, #tpu.memory_space<vmem>>, vector<1x1x350xf32>
    %48 = vector.shape_cast %47 : vector<1x1x350xf32> to vector<1x350xf32>
    %49 = vector.broadcast %46 : vector<6x1xf32> to vector<6x350xf32>
    %50 = vector.broadcast %48 : vector<1x350xf32> to vector<6x350xf32>
    %51 = arith.mulf %49, %50 : vector<6x350xf32>
    %52 = arith.addf %45, %51 : vector<6x350xf32>
    %53 = vector.extract_strided_slice %0 {offsets = [0, 7], sizes = [6, 1], strides = [1, 1]} : vector<6x10xf32> to vector<6x1xf32>
    %c0_19 = arith.constant 0 : index
    %c7 = arith.constant 7 : index
    %c0_20 = arith.constant 0 : index
    %54 = vector.load %arg0[%c0_19, %c7, %c0_20] : memref<2x36x350xf32, #tpu.memory_space<vmem>>, vector<1x1x350xf32>
    %55 = vector.shape_cast %54 : vector<1x1x350xf32> to vector<1x350xf32>
    %56 = vector.broadcast %53 : vector<6x1xf32> to vector<6x350xf32>
    %57 = vector.broadcast %55 : vector<1x350xf32> to vector<6x350xf32>
    %58 = arith.mulf %56, %57 : vector<6x350xf32>
    %59 = arith.addf %52, %58 : vector<6x350xf32>
    %60 = vector.extract_strided_slice %0 {offsets = [0, 8], sizes = [6, 1], strides = [1, 1]} : vector<6x10xf32> to vector<6x1xf32>
    %c0_21 = arith.constant 0 : index
    %c8_22 = arith.constant 8 : index
    %c0_23 = arith.constant 0 : index
    %61 = vector.load %arg0[%c0_21, %c8_22, %c0_23] : memref<2x36x350xf32, #tpu.memory_space<vmem>>, vector<1x1x350xf32>
    %62 = vector.shape_cast %61 : vector<1x1x350xf32> to vector<1x350xf32>
    %63 = vector.broadcast %60 : vector<6x1xf32> to vector<6x350xf32>
    %64 = vector.broadcast %62 : vector<1x350xf32> to vector<6x350xf32>
    %65 = arith.mulf %63, %64 : vector<6x350xf32>
    %66 = arith.addf %59, %65 : vector<6x350xf32>
    %67 = vector.extract_strided_slice %0 {offsets = [0, 0], sizes = [6, 1], strides = [1, 1]} : vector<6x10xf32> to vector<6x1xf32>
    %c0_24 = arith.constant 0 : index
    %c9 = arith.constant 9 : index
    %c0_25 = arith.constant 0 : index
    %68 = vector.load %arg0[%c0_24, %c9, %c0_25] : memref<2x36x350xf32, #tpu.memory_space<vmem>>, vector<1x1x350xf32>
    %69 = vector.shape_cast %68 : vector<1x1x350xf32> to vector<1x350xf32>
    %70 = vector.broadcast %67 : vector<6x1xf32> to vector<6x350xf32>
    %71 = vector.broadcast %69 : vector<1x350xf32> to vector<6x350xf32>
    %72 = arith.mulf %70, %71 : vector<6x350xf32>
    %73 = vector.extract_strided_slice %0 {offsets = [0, 1], sizes = [6, 1], strides = [1, 1]} : vector<6x10xf32> to vector<6x1xf32>
    %c0_26 = arith.constant 0 : index
    %c10 = arith.constant 10 : index
    %c0_27 = arith.constant 0 : index
    %74 = vector.load %arg0[%c0_26, %c10, %c0_27] : memref<2x36x350xf32, #tpu.memory_space<vmem>>, vector<1x1x350xf32>
    %75 = vector.shape_cast %74 : vector<1x1x350xf32> to vector<1x350xf32>
    %76 = vector.broadcast %73 : vector<6x1xf32> to vector<6x350xf32>
    %77 = vector.broadcast %75 : vector<1x350xf32> to vector<6x350xf32>
    %78 = arith.mulf %76, %77 : vector<6x350xf32>
    %79 = arith.addf %72, %78 : vector<6x350xf32>
    %80 = vector.extract_strided_slice %0 {offsets = [0, 2], sizes = [6, 1], strides = [1, 1]} : vector<6x10xf32> to vector<6x1xf32>
    %c0_28 = arith.constant 0 : index
    %c11 = arith.constant 11 : index
    %c0_29 = arith.constant 0 : index
    %81 = vector.load %arg0[%c0_28, %c11, %c0_29] : memref<2x36x350xf32, #tpu.memory_space<vmem>>, vector<1x1x350xf32>
    %82 = vector.shape_cast %81 : vector<1x1x350xf32> to vector<1x350xf32>
    %83 = vector.broadcast %80 : vector<6x1xf32> to vector<6x350xf32>
    %84 = vector.broadcast %82 : vector<1x350xf32> to vector<6x350xf32>
    %85 = arith.mulf %83, %84 : vector<6x350xf32>
    %86 = arith.addf %79, %85 : vector<6x350xf32>
    %87 = vector.extract_strided_slice %0 {offsets = [0, 3], sizes = [6, 1], strides = [1, 1]} : vector<6x10xf32> to vector<6x1xf32>
    %c0_30 = arith.constant 0 : index
    %c12 = arith.constant 12 : index
    %c0_31 = arith.constant 0 : index
    %88 = vector.load %arg0[%c0_30, %c12, %c0_31] : memref<2x36x350xf32, #tpu.memory_space<vmem>>, vector<1x1x350xf32>
    %89 = vector.shape_cast %88 : vector<1x1x350xf32> to vector<1x350xf32>
    %90 = vector.broadcast %87 : vector<6x1xf32> to vector<6x350xf32>
    %91 = vector.broadcast %89 : vector<1x350xf32> to vector<6x350xf32>
    %92 = arith.mulf %90, %91 : vector<6x350xf32>
    %93 = arith.addf %86, %92 : vector<6x350xf32>
    %94 = vector.extract_strided_slice %0 {offsets = [0, 4], sizes = [6, 1], strides = [1, 1]} : vector<6x10xf32> to vector<6x1xf32>
    %c0_32 = arith.constant 0 : index
    %c13 = arith.constant 13 : index
    %c0_33 = arith.constant 0 : index
    %95 = vector.load %arg0[%c0_32, %c13, %c0_33] : memref<2x36x350xf32, #tpu.memory_space<vmem>>, vector<1x1x350xf32>
    %96 = vector.shape_cast %95 : vector<1x1x350xf32> to vector<1x350xf32>
    %97 = vector.broadcast %94 : vector<6x1xf32> to vector<6x350xf32>
    %98 = vector.broadcast %96 : vector<1x350xf32> to vector<6x350xf32>
    %99 = arith.mulf %97, %98 : vector<6x350xf32>
    %100 = arith.addf %93, %99 : vector<6x350xf32>
    %101 = vector.extract_strided_slice %0 {offsets = [0, 5], sizes = [6, 1], strides = [1, 1]} : vector<6x10xf32> to vector<6x1xf32>
    %c0_34 = arith.constant 0 : index
    %c14 = arith.constant 14 : index
    %c0_35 = arith.constant 0 : index
    %102 = vector.load %arg0[%c0_34, %c14, %c0_35] : memref<2x36x350xf32, #tpu.memory_space<vmem>>, vector<1x1x350xf32>
    %103 = vector.shape_cast %102 : vector<1x1x350xf32> to vector<1x350xf32>
    %104 = vector.broadcast %101 : vector<6x1xf32> to vector<6x350xf32>
    %105 = vector.broadcast %103 : vector<1x350xf32> to vector<6x350xf32>
    %106 = arith.mulf %104, %105 : vector<6x350xf32>
    %107 = arith.addf %100, %106 : vector<6x350xf32>
    %108 = vector.extract_strided_slice %0 {offsets = [0, 6], sizes = [6, 1], strides = [1, 1]} : vector<6x10xf32> to vector<6x1xf32>
    %c0_36 = arith.constant 0 : index
    %c15 = arith.constant 15 : index
    %c0_37 = arith.constant 0 : index
    %109 = vector.load %arg0[%c0_36, %c15, %c0_37] : memref<2x36x350xf32, #tpu.memory_space<vmem>>, vector<1x1x350xf32>
    %110 = vector.shape_cast %109 : vector<1x1x350xf32> to vector<1x350xf32>
    %111 = vector.broadcast %108 : vector<6x1xf32> to vector<6x350xf32>
    %112 = vector.broadcast %110 : vector<1x350xf32> to vector<6x350xf32>
    %113 = arith.mulf %111, %112 : vector<6x350xf32>
    %114 = arith.addf %107, %113 : vector<6x350xf32>
    %115 = vector.extract_strided_slice %0 {offsets = [0, 7], sizes = [6, 1], strides = [1, 1]} : vector<6x10xf32> to vector<6x1xf32>
    %c0_38 = arith.constant 0 : index
    %c16_39 = arith.constant 16 : index
    %c0_40 = arith.constant 0 : index
    %116 = vector.load %arg0[%c0_38, %c16_39, %c0_40] : memref<2x36x350xf32, #tpu.memory_space<vmem>>, vector<1x1x350xf32>
    %117 = vector.shape_cast %116 : vector<1x1x350xf32> to vector<1x350xf32>
    %118 = vector.broadcast %115 : vector<6x1xf32> to vector<6x350xf32>
    %119 = vector.broadcast %117 : vector<1x350xf32> to vector<6x350xf32>
    %120 = arith.mulf %118, %119 : vector<6x350xf32>
    %121 = arith.addf %114, %120 : vector<6x350xf32>
    %122 = vector.extract_strided_slice %0 {offsets = [0, 8], sizes = [6, 1], strides = [1, 1]} : vector<6x10xf32> to vector<6x1xf32>
    %c0_41 = arith.constant 0 : index
    %c17 = arith.constant 17 : index
    %c0_42 = arith.constant 0 : index
    %123 = vector.load %arg0[%c0_41, %c17, %c0_42] : memref<2x36x350xf32, #tpu.memory_space<vmem>>, vector<1x1x350xf32>
    %124 = vector.shape_cast %123 : vector<1x1x350xf32> to vector<1x350xf32>
    %125 = vector.broadcast %122 : vector<6x1xf32> to vector<6x350xf32>
    %126 = vector.broadcast %124 : vector<1x350xf32> to vector<6x350xf32>
    %127 = arith.mulf %125, %126 : vector<6x350xf32>
    %128 = arith.addf %121, %127 : vector<6x350xf32>
    %129 = arith.maximumf %66, %128 : vector<6x350xf32>
    %130 = vector.extract_strided_slice %0 {offsets = [0, 0], sizes = [6, 1], strides = [1, 1]} : vector<6x10xf32> to vector<6x1xf32>
    %c0_43 = arith.constant 0 : index
    %c18 = arith.constant 18 : index
    %c0_44 = arith.constant 0 : index
    %131 = vector.load %arg0[%c0_43, %c18, %c0_44] : memref<2x36x350xf32, #tpu.memory_space<vmem>>, vector<1x1x350xf32>
    %132 = vector.shape_cast %131 : vector<1x1x350xf32> to vector<1x350xf32>
    %133 = vector.broadcast %130 : vector<6x1xf32> to vector<6x350xf32>
    %134 = vector.broadcast %132 : vector<1x350xf32> to vector<6x350xf32>
    %135 = arith.mulf %133, %134 : vector<6x350xf32>
    %136 = vector.extract_strided_slice %0 {offsets = [0, 1], sizes = [6, 1], strides = [1, 1]} : vector<6x10xf32> to vector<6x1xf32>
    %c0_45 = arith.constant 0 : index
    %c19 = arith.constant 19 : index
    %c0_46 = arith.constant 0 : index
    %137 = vector.load %arg0[%c0_45, %c19, %c0_46] : memref<2x36x350xf32, #tpu.memory_space<vmem>>, vector<1x1x350xf32>
    %138 = vector.shape_cast %137 : vector<1x1x350xf32> to vector<1x350xf32>
    %139 = vector.broadcast %136 : vector<6x1xf32> to vector<6x350xf32>
    %140 = vector.broadcast %138 : vector<1x350xf32> to vector<6x350xf32>
    %141 = arith.mulf %139, %140 : vector<6x350xf32>
    %142 = arith.addf %135, %141 : vector<6x350xf32>
    %143 = vector.extract_strided_slice %0 {offsets = [0, 2], sizes = [6, 1], strides = [1, 1]} : vector<6x10xf32> to vector<6x1xf32>
    %c0_47 = arith.constant 0 : index
    %c20 = arith.constant 20 : index
    %c0_48 = arith.constant 0 : index
    %144 = vector.load %arg0[%c0_47, %c20, %c0_48] : memref<2x36x350xf32, #tpu.memory_space<vmem>>, vector<1x1x350xf32>
    %145 = vector.shape_cast %144 : vector<1x1x350xf32> to vector<1x350xf32>
    %146 = vector.broadcast %143 : vector<6x1xf32> to vector<6x350xf32>
    %147 = vector.broadcast %145 : vector<1x350xf32> to vector<6x350xf32>
    %148 = arith.mulf %146, %147 : vector<6x350xf32>
    %149 = arith.addf %142, %148 : vector<6x350xf32>
    %150 = vector.extract_strided_slice %0 {offsets = [0, 3], sizes = [6, 1], strides = [1, 1]} : vector<6x10xf32> to vector<6x1xf32>
    %c0_49 = arith.constant 0 : index
    %c21 = arith.constant 21 : index
    %c0_50 = arith.constant 0 : index
    %151 = vector.load %arg0[%c0_49, %c21, %c0_50] : memref<2x36x350xf32, #tpu.memory_space<vmem>>, vector<1x1x350xf32>
    %152 = vector.shape_cast %151 : vector<1x1x350xf32> to vector<1x350xf32>
    %153 = vector.broadcast %150 : vector<6x1xf32> to vector<6x350xf32>
    %154 = vector.broadcast %152 : vector<1x350xf32> to vector<6x350xf32>
    %155 = arith.mulf %153, %154 : vector<6x350xf32>
    %156 = arith.addf %149, %155 : vector<6x350xf32>
    %157 = vector.extract_strided_slice %0 {offsets = [0, 4], sizes = [6, 1], strides = [1, 1]} : vector<6x10xf32> to vector<6x1xf32>
    %c0_51 = arith.constant 0 : index
    %c22_52 = arith.constant 22 : index
    %c0_53 = arith.constant 0 : index
    %158 = vector.load %arg0[%c0_51, %c22_52, %c0_53] : memref<2x36x350xf32, #tpu.memory_space<vmem>>, vector<1x1x350xf32>
    %159 = vector.shape_cast %158 : vector<1x1x350xf32> to vector<1x350xf32>
    %160 = vector.broadcast %157 : vector<6x1xf32> to vector<6x350xf32>
    %161 = vector.broadcast %159 : vector<1x350xf32> to vector<6x350xf32>
    %162 = arith.mulf %160, %161 : vector<6x350xf32>
    %163 = arith.addf %156, %162 : vector<6x350xf32>
    %164 = vector.extract_strided_slice %0 {offsets = [0, 5], sizes = [6, 1], strides = [1, 1]} : vector<6x10xf32> to vector<6x1xf32>
    %c0_54 = arith.constant 0 : index
    %c23 = arith.constant 23 : index
    %c0_55 = arith.constant 0 : index
    %165 = vector.load %arg0[%c0_54, %c23, %c0_55] : memref<2x36x350xf32, #tpu.memory_space<vmem>>, vector<1x1x350xf32>
    %166 = vector.shape_cast %165 : vector<1x1x350xf32> to vector<1x350xf32>
    %167 = vector.broadcast %164 : vector<6x1xf32> to vector<6x350xf32>
    %168 = vector.broadcast %166 : vector<1x350xf32> to vector<6x350xf32>
    %169 = arith.mulf %167, %168 : vector<6x350xf32>
    %170 = arith.addf %163, %169 : vector<6x350xf32>
    %171 = vector.extract_strided_slice %0 {offsets = [0, 6], sizes = [6, 1], strides = [1, 1]} : vector<6x10xf32> to vector<6x1xf32>
    %c0_56 = arith.constant 0 : index
    %c24 = arith.constant 24 : index
    %c0_57 = arith.constant 0 : index
    %172 = vector.load %arg0[%c0_56, %c24, %c0_57] : memref<2x36x350xf32, #tpu.memory_space<vmem>>, vector<1x1x350xf32>
    %173 = vector.shape_cast %172 : vector<1x1x350xf32> to vector<1x350xf32>
    %174 = vector.broadcast %171 : vector<6x1xf32> to vector<6x350xf32>
    %175 = vector.broadcast %173 : vector<1x350xf32> to vector<6x350xf32>
    %176 = arith.mulf %174, %175 : vector<6x350xf32>
    %177 = arith.addf %170, %176 : vector<6x350xf32>
    %178 = vector.extract_strided_slice %0 {offsets = [0, 7], sizes = [6, 1], strides = [1, 1]} : vector<6x10xf32> to vector<6x1xf32>
    %c0_58 = arith.constant 0 : index
    %c25 = arith.constant 25 : index
    %c0_59 = arith.constant 0 : index
    %179 = vector.load %arg0[%c0_58, %c25, %c0_59] : memref<2x36x350xf32, #tpu.memory_space<vmem>>, vector<1x1x350xf32>
    %180 = vector.shape_cast %179 : vector<1x1x350xf32> to vector<1x350xf32>
    %181 = vector.broadcast %178 : vector<6x1xf32> to vector<6x350xf32>
    %182 = vector.broadcast %180 : vector<1x350xf32> to vector<6x350xf32>
    %183 = arith.mulf %181, %182 : vector<6x350xf32>
    %184 = arith.addf %177, %183 : vector<6x350xf32>
    %185 = vector.extract_strided_slice %0 {offsets = [0, 8], sizes = [6, 1], strides = [1, 1]} : vector<6x10xf32> to vector<6x1xf32>
    %c0_60 = arith.constant 0 : index
    %c26 = arith.constant 26 : index
    %c0_61 = arith.constant 0 : index
    %186 = vector.load %arg0[%c0_60, %c26, %c0_61] : memref<2x36x350xf32, #tpu.memory_space<vmem>>, vector<1x1x350xf32>
    %187 = vector.shape_cast %186 : vector<1x1x350xf32> to vector<1x350xf32>
    %188 = vector.broadcast %185 : vector<6x1xf32> to vector<6x350xf32>
    %189 = vector.broadcast %187 : vector<1x350xf32> to vector<6x350xf32>
    %190 = arith.mulf %188, %189 : vector<6x350xf32>
    %191 = arith.addf %184, %190 : vector<6x350xf32>
    %192 = arith.maximumf %129, %191 : vector<6x350xf32>
    %193 = vector.extract_strided_slice %0 {offsets = [0, 0], sizes = [6, 1], strides = [1, 1]} : vector<6x10xf32> to vector<6x1xf32>
    %c0_62 = arith.constant 0 : index
    %c27 = arith.constant 27 : index
    %c0_63 = arith.constant 0 : index
    %194 = vector.load %arg0[%c0_62, %c27, %c0_63] : memref<2x36x350xf32, #tpu.memory_space<vmem>>, vector<1x1x350xf32>
    %195 = vector.shape_cast %194 : vector<1x1x350xf32> to vector<1x350xf32>
    %196 = vector.broadcast %193 : vector<6x1xf32> to vector<6x350xf32>
    %197 = vector.broadcast %195 : vector<1x350xf32> to vector<6x350xf32>
    %198 = arith.mulf %196, %197 : vector<6x350xf32>
    %199 = vector.extract_strided_slice %0 {offsets = [0, 1], sizes = [6, 1], strides = [1, 1]} : vector<6x10xf32> to vector<6x1xf32>
    %c0_64 = arith.constant 0 : index
    %c28 = arith.constant 28 : index
    %c0_65 = arith.constant 0 : index
    %200 = vector.load %arg0[%c0_64, %c28, %c0_65] : memref<2x36x350xf32, #tpu.memory_space<vmem>>, vector<1x1x350xf32>
    %201 = vector.shape_cast %200 : vector<1x1x350xf32> to vector<1x350xf32>
    %202 = vector.broadcast %199 : vector<6x1xf32> to vector<6x350xf32>
    %203 = vector.broadcast %201 : vector<1x350xf32> to vector<6x350xf32>
    %204 = arith.mulf %202, %203 : vector<6x350xf32>
    %205 = arith.addf %198, %204 : vector<6x350xf32>
    %206 = vector.extract_strided_slice %0 {offsets = [0, 2], sizes = [6, 1], strides = [1, 1]} : vector<6x10xf32> to vector<6x1xf32>
    %c0_66 = arith.constant 0 : index
    %c29 = arith.constant 29 : index
    %c0_67 = arith.constant 0 : index
    %207 = vector.load %arg0[%c0_66, %c29, %c0_67] : memref<2x36x350xf32, #tpu.memory_space<vmem>>, vector<1x1x350xf32>
    %208 = vector.shape_cast %207 : vector<1x1x350xf32> to vector<1x350xf32>
    %209 = vector.broadcast %206 : vector<6x1xf32> to vector<6x350xf32>
    %210 = vector.broadcast %208 : vector<1x350xf32> to vector<6x350xf32>
    %211 = arith.mulf %209, %210 : vector<6x350xf32>
    %212 = arith.addf %205, %211 : vector<6x350xf32>
    %213 = vector.extract_strided_slice %0 {offsets = [0, 3], sizes = [6, 1], strides = [1, 1]} : vector<6x10xf32> to vector<6x1xf32>
    %c0_68 = arith.constant 0 : index
    %c30 = arith.constant 30 : index
    %c0_69 = arith.constant 0 : index
    %214 = vector.load %arg0[%c0_68, %c30, %c0_69] : memref<2x36x350xf32, #tpu.memory_space<vmem>>, vector<1x1x350xf32>
    %215 = vector.shape_cast %214 : vector<1x1x350xf32> to vector<1x350xf32>
    %216 = vector.broadcast %213 : vector<6x1xf32> to vector<6x350xf32>
    %217 = vector.broadcast %215 : vector<1x350xf32> to vector<6x350xf32>
    %218 = arith.mulf %216, %217 : vector<6x350xf32>
    %219 = arith.addf %212, %218 : vector<6x350xf32>
    %220 = vector.extract_strided_slice %0 {offsets = [0, 4], sizes = [6, 1], strides = [1, 1]} : vector<6x10xf32> to vector<6x1xf32>
    %c0_70 = arith.constant 0 : index
    %c31 = arith.constant 31 : index
    %c0_71 = arith.constant 0 : index
    %221 = vector.load %arg0[%c0_70, %c31, %c0_71] : memref<2x36x350xf32, #tpu.memory_space<vmem>>, vector<1x1x350xf32>
    %222 = vector.shape_cast %221 : vector<1x1x350xf32> to vector<1x350xf32>
    %223 = vector.broadcast %220 : vector<6x1xf32> to vector<6x350xf32>
    %224 = vector.broadcast %222 : vector<1x350xf32> to vector<6x350xf32>
    %225 = arith.mulf %223, %224 : vector<6x350xf32>
    %226 = arith.addf %219, %225 : vector<6x350xf32>
    %227 = vector.extract_strided_slice %0 {offsets = [0, 5], sizes = [6, 1], strides = [1, 1]} : vector<6x10xf32> to vector<6x1xf32>
    %c0_72 = arith.constant 0 : index
    %c32 = arith.constant 32 : index
    %c0_73 = arith.constant 0 : index
    %228 = vector.load %arg0[%c0_72, %c32, %c0_73] : memref<2x36x350xf32, #tpu.memory_space<vmem>>, vector<1x1x350xf32>
    %229 = vector.shape_cast %228 : vector<1x1x350xf32> to vector<1x350xf32>
    %230 = vector.broadcast %227 : vector<6x1xf32> to vector<6x350xf32>
    %231 = vector.broadcast %229 : vector<1x350xf32> to vector<6x350xf32>
    %232 = arith.mulf %230, %231 : vector<6x350xf32>
    %233 = arith.addf %226, %232 : vector<6x350xf32>
    %234 = vector.extract_strided_slice %0 {offsets = [0, 6], sizes = [6, 1], strides = [1, 1]} : vector<6x10xf32> to vector<6x1xf32>
    %c0_74 = arith.constant 0 : index
    %c33 = arith.constant 33 : index
    %c0_75 = arith.constant 0 : index
    %235 = vector.load %arg0[%c0_74, %c33, %c0_75] : memref<2x36x350xf32, #tpu.memory_space<vmem>>, vector<1x1x350xf32>
    %236 = vector.shape_cast %235 : vector<1x1x350xf32> to vector<1x350xf32>
    %237 = vector.broadcast %234 : vector<6x1xf32> to vector<6x350xf32>
    %238 = vector.broadcast %236 : vector<1x350xf32> to vector<6x350xf32>
    %239 = arith.mulf %237, %238 : vector<6x350xf32>
    %240 = arith.addf %233, %239 : vector<6x350xf32>
    %241 = vector.extract_strided_slice %0 {offsets = [0, 7], sizes = [6, 1], strides = [1, 1]} : vector<6x10xf32> to vector<6x1xf32>
    %c0_76 = arith.constant 0 : index
    %c34 = arith.constant 34 : index
    %c0_77 = arith.constant 0 : index
    %242 = vector.load %arg0[%c0_76, %c34, %c0_77] : memref<2x36x350xf32, #tpu.memory_space<vmem>>, vector<1x1x350xf32>
    %243 = vector.shape_cast %242 : vector<1x1x350xf32> to vector<1x350xf32>
    %244 = vector.broadcast %241 : vector<6x1xf32> to vector<6x350xf32>
    %245 = vector.broadcast %243 : vector<1x350xf32> to vector<6x350xf32>
    %246 = arith.mulf %244, %245 : vector<6x350xf32>
    %247 = arith.addf %240, %246 : vector<6x350xf32>
    %248 = vector.extract_strided_slice %0 {offsets = [0, 8], sizes = [6, 1], strides = [1, 1]} : vector<6x10xf32> to vector<6x1xf32>
    %c0_78 = arith.constant 0 : index
    %c35 = arith.constant 35 : index
    %c0_79 = arith.constant 0 : index
    %249 = vector.load %arg0[%c0_78, %c35, %c0_79] : memref<2x36x350xf32, #tpu.memory_space<vmem>>, vector<1x1x350xf32>
    %250 = vector.shape_cast %249 : vector<1x1x350xf32> to vector<1x350xf32>
    %251 = vector.broadcast %248 : vector<6x1xf32> to vector<6x350xf32>
    %252 = vector.broadcast %250 : vector<1x350xf32> to vector<6x350xf32>
    %253 = arith.mulf %251, %252 : vector<6x350xf32>
    %254 = arith.addf %247, %253 : vector<6x350xf32>
    %255 = arith.maximumf %192, %254 : vector<6x350xf32>
    %256 = vector.broadcast %1 : vector<6x1xf32> to vector<6x350xf32>
    %257 = arith.addf %255, %256 : vector<6x350xf32>
    %cst = arith.constant 0.00999999977 : f32
    %258 = vector.broadcast %cst : f32 to vector<6x350xf32>
    %259 = arith.mulf %258, %257 : vector<6x350xf32>
    %260 = arith.maximumf %257, %259 : vector<6x350xf32>
    %261 = arith.mulf %260, %2 : vector<6x350xf32>
    %cst_80 = arith.constant dense<0.000000e+00> : vector<6xf32>
    %262 = vector.multi_reduction <add>, %261, %cst_80 [1] : vector<6x350xf32> to vector<6xf32>
    %263 = vector.shape_cast %262 : vector<6xf32> to vector<6x1xf32>
    %cst_81 = arith.constant dense<0.000000e+00> : vector<1xf32>
    %264 = vector.multi_reduction <add>, %263, %cst_81 [0] : vector<6x1xf32> to vector<1xf32>
    %265 = vector.shape_cast %264 : vector<1xf32> to vector<1x1xf32>
    %266 = arith.mulf %260, %3 : vector<6x350xf32>
    %cst_82 = arith.constant dense<0.000000e+00> : vector<6xf32>
    %267 = vector.multi_reduction <add>, %266, %cst_82 [1] : vector<6x350xf32> to vector<6xf32>
    %268 = vector.shape_cast %267 : vector<6xf32> to vector<6x1xf32>
    %cst_83 = arith.constant dense<0.000000e+00> : vector<1xf32>
    %269 = vector.multi_reduction <add>, %268, %cst_83 [0] : vector<6x1xf32> to vector<1xf32>
    %270 = vector.shape_cast %269 : vector<1xf32> to vector<1x1xf32>
    %271 = tpu.concatenate %265, %270 in 1 : vector<1x1xf32>, vector<1x1xf32> -> vector<1x2xf32>
    %272 = vector.extract_strided_slice %0 {offsets = [0, 0], sizes = [6, 1], strides = [1, 1]} : vector<6x10xf32> to vector<6x1xf32>
    %c1_84 = arith.constant 1 : index
    %c0_85 = arith.constant 0 : index
    %c0_86 = arith.constant 0 : index
    %273 = vector.load %arg0[%c1_84, %c0_85, %c0_86] : memref<2x36x350xf32, #tpu.memory_space<vmem>>, vector<1x1x350xf32>
    %274 = vector.shape_cast %273 : vector<1x1x350xf32> to vector<1x350xf32>
    %275 = vector.broadcast %272 : vector<6x1xf32> to vector<6x350xf32>
    %276 = vector.broadcast %274 : vector<1x350xf32> to vector<6x350xf32>
    %277 = arith.mulf %275, %276 : vector<6x350xf32>
    %278 = vector.extract_strided_slice %0 {offsets = [0, 1], sizes = [6, 1], strides = [1, 1]} : vector<6x10xf32> to vector<6x1xf32>
    %c1_87 = arith.constant 1 : index
    %c1_88 = arith.constant 1 : index
    %c0_89 = arith.constant 0 : index
    %279 = vector.load %arg0[%c1_87, %c1_88, %c0_89] : memref<2x36x350xf32, #tpu.memory_space<vmem>>, vector<1x1x350xf32>
    %280 = vector.shape_cast %279 : vector<1x1x350xf32> to vector<1x350xf32>
    %281 = vector.broadcast %278 : vector<6x1xf32> to vector<6x350xf32>
    %282 = vector.broadcast %280 : vector<1x350xf32> to vector<6x350xf32>
    %283 = arith.mulf %281, %282 : vector<6x350xf32>
    %284 = arith.addf %277, %283 : vector<6x350xf32>
    %285 = vector.extract_strided_slice %0 {offsets = [0, 2], sizes = [6, 1], strides = [1, 1]} : vector<6x10xf32> to vector<6x1xf32>
    %c1_90 = arith.constant 1 : index
    %c2_91 = arith.constant 2 : index
    %c0_92 = arith.constant 0 : index
    %286 = vector.load %arg0[%c1_90, %c2_91, %c0_92] : memref<2x36x350xf32, #tpu.memory_space<vmem>>, vector<1x1x350xf32>
    %287 = vector.shape_cast %286 : vector<1x1x350xf32> to vector<1x350xf32>
    %288 = vector.broadcast %285 : vector<6x1xf32> to vector<6x350xf32>
    %289 = vector.broadcast %287 : vector<1x350xf32> to vector<6x350xf32>
    %290 = arith.mulf %288, %289 : vector<6x350xf32>
    %291 = arith.addf %284, %290 : vector<6x350xf32>
    %292 = vector.extract_strided_slice %0 {offsets = [0, 3], sizes = [6, 1], strides = [1, 1]} : vector<6x10xf32> to vector<6x1xf32>
    %c1_93 = arith.constant 1 : index
    %c3_94 = arith.constant 3 : index
    %c0_95 = arith.constant 0 : index
    %293 = vector.load %arg0[%c1_93, %c3_94, %c0_95] : memref<2x36x350xf32, #tpu.memory_space<vmem>>, vector<1x1x350xf32>
    %294 = vector.shape_cast %293 : vector<1x1x350xf32> to vector<1x350xf32>
    %295 = vector.broadcast %292 : vector<6x1xf32> to vector<6x350xf32>
    %296 = vector.broadcast %294 : vector<1x350xf32> to vector<6x350xf32>
    %297 = arith.mulf %295, %296 : vector<6x350xf32>
    %298 = arith.addf %291, %297 : vector<6x350xf32>
    %299 = vector.extract_strided_slice %0 {offsets = [0, 4], sizes = [6, 1], strides = [1, 1]} : vector<6x10xf32> to vector<6x1xf32>
    %c1_96 = arith.constant 1 : index
    %c4_97 = arith.constant 4 : index
    %c0_98 = arith.constant 0 : index
    %300 = vector.load %arg0[%c1_96, %c4_97, %c0_98] : memref<2x36x350xf32, #tpu.memory_space<vmem>>, vector<1x1x350xf32>
    %301 = vector.shape_cast %300 : vector<1x1x350xf32> to vector<1x350xf32>
    %302 = vector.broadcast %299 : vector<6x1xf32> to vector<6x350xf32>
    %303 = vector.broadcast %301 : vector<1x350xf32> to vector<6x350xf32>
    %304 = arith.mulf %302, %303 : vector<6x350xf32>
    %305 = arith.addf %298, %304 : vector<6x350xf32>
    %306 = vector.extract_strided_slice %0 {offsets = [0, 5], sizes = [6, 1], strides = [1, 1]} : vector<6x10xf32> to vector<6x1xf32>
    %c1_99 = arith.constant 1 : index
    %c5_100 = arith.constant 5 : index
    %c0_101 = arith.constant 0 : index
    %307 = vector.load %arg0[%c1_99, %c5_100, %c0_101] : memref<2x36x350xf32, #tpu.memory_space<vmem>>, vector<1x1x350xf32>
    %308 = vector.shape_cast %307 : vector<1x1x350xf32> to vector<1x350xf32>
    %309 = vector.broadcast %306 : vector<6x1xf32> to vector<6x350xf32>
    %310 = vector.broadcast %308 : vector<1x350xf32> to vector<6x350xf32>
    %311 = arith.mulf %309, %310 : vector<6x350xf32>
    %312 = arith.addf %305, %311 : vector<6x350xf32>
    %313 = vector.extract_strided_slice %0 {offsets = [0, 6], sizes = [6, 1], strides = [1, 1]} : vector<6x10xf32> to vector<6x1xf32>
    %c1_102 = arith.constant 1 : index
    %c6_103 = arith.constant 6 : index
    %c0_104 = arith.constant 0 : index
    %314 = vector.load %arg0[%c1_102, %c6_103, %c0_104] : memref<2x36x350xf32, #tpu.memory_space<vmem>>, vector<1x1x350xf32>
    %315 = vector.shape_cast %314 : vector<1x1x350xf32> to vector<1x350xf32>
    %316 = vector.broadcast %313 : vector<6x1xf32> to vector<6x350xf32>
    %317 = vector.broadcast %315 : vector<1x350xf32> to vector<6x350xf32>
    %318 = arith.mulf %316, %317 : vector<6x350xf32>
    %319 = arith.addf %312, %318 : vector<6x350xf32>
    %320 = vector.extract_strided_slice %0 {offsets = [0, 7], sizes = [6, 1], strides = [1, 1]} : vector<6x10xf32> to vector<6x1xf32>
    %c1_105 = arith.constant 1 : index
    %c7_106 = arith.constant 7 : index
    %c0_107 = arith.constant 0 : index
    %321 = vector.load %arg0[%c1_105, %c7_106, %c0_107] : memref<2x36x350xf32, #tpu.memory_space<vmem>>, vector<1x1x350xf32>
    %322 = vector.shape_cast %321 : vector<1x1x350xf32> to vector<1x350xf32>
    %323 = vector.broadcast %320 : vector<6x1xf32> to vector<6x350xf32>
    %324 = vector.broadcast %322 : vector<1x350xf32> to vector<6x350xf32>
    %325 = arith.mulf %323, %324 : vector<6x350xf32>
    %326 = arith.addf %319, %325 : vector<6x350xf32>
    %327 = vector.extract_strided_slice %0 {offsets = [0, 8], sizes = [6, 1], strides = [1, 1]} : vector<6x10xf32> to vector<6x1xf32>
    %c1_108 = arith.constant 1 : index
    %c8_109 = arith.constant 8 : index
    %c0_110 = arith.constant 0 : index
    %328 = vector.load %arg0[%c1_108, %c8_109, %c0_110] : memref<2x36x350xf32, #tpu.memory_space<vmem>>, vector<1x1x350xf32>
    %329 = vector.shape_cast %328 : vector<1x1x350xf32> to vector<1x350xf32>
    %330 = vector.broadcast %327 : vector<6x1xf32> to vector<6x350xf32>
    %331 = vector.broadcast %329 : vector<1x350xf32> to vector<6x350xf32>
    %332 = arith.mulf %330, %331 : vector<6x350xf32>
    %333 = arith.addf %326, %332 : vector<6x350xf32>
    %334 = vector.extract_strided_slice %0 {offsets = [0, 0], sizes = [6, 1], strides = [1, 1]} : vector<6x10xf32> to vector<6x1xf32>
    %c1_111 = arith.constant 1 : index
    %c9_112 = arith.constant 9 : index
    %c0_113 = arith.constant 0 : index
    %335 = vector.load %arg0[%c1_111, %c9_112, %c0_113] : memref<2x36x350xf32, #tpu.memory_space<vmem>>, vector<1x1x350xf32>
    %336 = vector.shape_cast %335 : vector<1x1x350xf32> to vector<1x350xf32>
    %337 = vector.broadcast %334 : vector<6x1xf32> to vector<6x350xf32>
    %338 = vector.broadcast %336 : vector<1x350xf32> to vector<6x350xf32>
    %339 = arith.mulf %337, %338 : vector<6x350xf32>
    %340 = vector.extract_strided_slice %0 {offsets = [0, 1], sizes = [6, 1], strides = [1, 1]} : vector<6x10xf32> to vector<6x1xf32>
    %c1_114 = arith.constant 1 : index
    %c10_115 = arith.constant 10 : index
    %c0_116 = arith.constant 0 : index
    %341 = vector.load %arg0[%c1_114, %c10_115, %c0_116] : memref<2x36x350xf32, #tpu.memory_space<vmem>>, vector<1x1x350xf32>
    %342 = vector.shape_cast %341 : vector<1x1x350xf32> to vector<1x350xf32>
    %343 = vector.broadcast %340 : vector<6x1xf32> to vector<6x350xf32>
    %344 = vector.broadcast %342 : vector<1x350xf32> to vector<6x350xf32>
    %345 = arith.mulf %343, %344 : vector<6x350xf32>
    %346 = arith.addf %339, %345 : vector<6x350xf32>
    %347 = vector.extract_strided_slice %0 {offsets = [0, 2], sizes = [6, 1], strides = [1, 1]} : vector<6x10xf32> to vector<6x1xf32>
    %c1_117 = arith.constant 1 : index
    %c11_118 = arith.constant 11 : index
    %c0_119 = arith.constant 0 : index
    %348 = vector.load %arg0[%c1_117, %c11_118, %c0_119] : memref<2x36x350xf32, #tpu.memory_space<vmem>>, vector<1x1x350xf32>
    %349 = vector.shape_cast %348 : vector<1x1x350xf32> to vector<1x350xf32>
    %350 = vector.broadcast %347 : vector<6x1xf32> to vector<6x350xf32>
    %351 = vector.broadcast %349 : vector<1x350xf32> to vector<6x350xf32>
    %352 = arith.mulf %350, %351 : vector<6x350xf32>
    %353 = arith.addf %346, %352 : vector<6x350xf32>
    %354 = vector.extract_strided_slice %0 {offsets = [0, 3], sizes = [6, 1], strides = [1, 1]} : vector<6x10xf32> to vector<6x1xf32>
    %c1_120 = arith.constant 1 : index
    %c12_121 = arith.constant 12 : index
    %c0_122 = arith.constant 0 : index
    %355 = vector.load %arg0[%c1_120, %c12_121, %c0_122] : memref<2x36x350xf32, #tpu.memory_space<vmem>>, vector<1x1x350xf32>
    %356 = vector.shape_cast %355 : vector<1x1x350xf32> to vector<1x350xf32>
    %357 = vector.broadcast %354 : vector<6x1xf32> to vector<6x350xf32>
    %358 = vector.broadcast %356 : vector<1x350xf32> to vector<6x350xf32>
    %359 = arith.mulf %357, %358 : vector<6x350xf32>
    %360 = arith.addf %353, %359 : vector<6x350xf32>
    %361 = vector.extract_strided_slice %0 {offsets = [0, 4], sizes = [6, 1], strides = [1, 1]} : vector<6x10xf32> to vector<6x1xf32>
    %c1_123 = arith.constant 1 : index
    %c13_124 = arith.constant 13 : index
    %c0_125 = arith.constant 0 : index
    %362 = vector.load %arg0[%c1_123, %c13_124, %c0_125] : memref<2x36x350xf32, #tpu.memory_space<vmem>>, vector<1x1x350xf32>
    %363 = vector.shape_cast %362 : vector<1x1x350xf32> to vector<1x350xf32>
    %364 = vector.broadcast %361 : vector<6x1xf32> to vector<6x350xf32>
    %365 = vector.broadcast %363 : vector<1x350xf32> to vector<6x350xf32>
    %366 = arith.mulf %364, %365 : vector<6x350xf32>
    %367 = arith.addf %360, %366 : vector<6x350xf32>
    %368 = vector.extract_strided_slice %0 {offsets = [0, 5], sizes = [6, 1], strides = [1, 1]} : vector<6x10xf32> to vector<6x1xf32>
    %c1_126 = arith.constant 1 : index
    %c14_127 = arith.constant 14 : index
    %c0_128 = arith.constant 0 : index
    %369 = vector.load %arg0[%c1_126, %c14_127, %c0_128] : memref<2x36x350xf32, #tpu.memory_space<vmem>>, vector<1x1x350xf32>
    %370 = vector.shape_cast %369 : vector<1x1x350xf32> to vector<1x350xf32>
    %371 = vector.broadcast %368 : vector<6x1xf32> to vector<6x350xf32>
    %372 = vector.broadcast %370 : vector<1x350xf32> to vector<6x350xf32>
    %373 = arith.mulf %371, %372 : vector<6x350xf32>
    %374 = arith.addf %367, %373 : vector<6x350xf32>
    %375 = vector.extract_strided_slice %0 {offsets = [0, 6], sizes = [6, 1], strides = [1, 1]} : vector<6x10xf32> to vector<6x1xf32>
    %c1_129 = arith.constant 1 : index
    %c15_130 = arith.constant 15 : index
    %c0_131 = arith.constant 0 : index
    %376 = vector.load %arg0[%c1_129, %c15_130, %c0_131] : memref<2x36x350xf32, #tpu.memory_space<vmem>>, vector<1x1x350xf32>
    %377 = vector.shape_cast %376 : vector<1x1x350xf32> to vector<1x350xf32>
    %378 = vector.broadcast %375 : vector<6x1xf32> to vector<6x350xf32>
    %379 = vector.broadcast %377 : vector<1x350xf32> to vector<6x350xf32>
    %380 = arith.mulf %378, %379 : vector<6x350xf32>
    %381 = arith.addf %374, %380 : vector<6x350xf32>
    %382 = vector.extract_strided_slice %0 {offsets = [0, 7], sizes = [6, 1], strides = [1, 1]} : vector<6x10xf32> to vector<6x1xf32>
    %c1_132 = arith.constant 1 : index
    %c16_133 = arith.constant 16 : index
    %c0_134 = arith.constant 0 : index
    %383 = vector.load %arg0[%c1_132, %c16_133, %c0_134] : memref<2x36x350xf32, #tpu.memory_space<vmem>>, vector<1x1x350xf32>
    %384 = vector.shape_cast %383 : vector<1x1x350xf32> to vector<1x350xf32>
    %385 = vector.broadcast %382 : vector<6x1xf32> to vector<6x350xf32>
    %386 = vector.broadcast %384 : vector<1x350xf32> to vector<6x350xf32>
    %387 = arith.mulf %385, %386 : vector<6x350xf32>
    %388 = arith.addf %381, %387 : vector<6x350xf32>
    %389 = vector.extract_strided_slice %0 {offsets = [0, 8], sizes = [6, 1], strides = [1, 1]} : vector<6x10xf32> to vector<6x1xf32>
    %c1_135 = arith.constant 1 : index
    %c17_136 = arith.constant 17 : index
    %c0_137 = arith.constant 0 : index
    %390 = vector.load %arg0[%c1_135, %c17_136, %c0_137] : memref<2x36x350xf32, #tpu.memory_space<vmem>>, vector<1x1x350xf32>
    %391 = vector.shape_cast %390 : vector<1x1x350xf32> to vector<1x350xf32>
    %392 = vector.broadcast %389 : vector<6x1xf32> to vector<6x350xf32>
    %393 = vector.broadcast %391 : vector<1x350xf32> to vector<6x350xf32>
    %394 = arith.mulf %392, %393 : vector<6x350xf32>
    %395 = arith.addf %388, %394 : vector<6x350xf32>
    %396 = arith.maximumf %333, %395 : vector<6x350xf32>
    %397 = vector.extract_strided_slice %0 {offsets = [0, 0], sizes = [6, 1], strides = [1, 1]} : vector<6x10xf32> to vector<6x1xf32>
    %c1_138 = arith.constant 1 : index
    %c18_139 = arith.constant 18 : index
    %c0_140 = arith.constant 0 : index
    %398 = vector.load %arg0[%c1_138, %c18_139, %c0_140] : memref<2x36x350xf32, #tpu.memory_space<vmem>>, vector<1x1x350xf32>
    %399 = vector.shape_cast %398 : vector<1x1x350xf32> to vector<1x350xf32>
    %400 = vector.broadcast %397 : vector<6x1xf32> to vector<6x350xf32>
    %401 = vector.broadcast %399 : vector<1x350xf32> to vector<6x350xf32>
    %402 = arith.mulf %400, %401 : vector<6x350xf32>
    %403 = vector.extract_strided_slice %0 {offsets = [0, 1], sizes = [6, 1], strides = [1, 1]} : vector<6x10xf32> to vector<6x1xf32>
    %c1_141 = arith.constant 1 : index
    %c19_142 = arith.constant 19 : index
    %c0_143 = arith.constant 0 : index
    %404 = vector.load %arg0[%c1_141, %c19_142, %c0_143] : memref<2x36x350xf32, #tpu.memory_space<vmem>>, vector<1x1x350xf32>
    %405 = vector.shape_cast %404 : vector<1x1x350xf32> to vector<1x350xf32>
    %406 = vector.broadcast %403 : vector<6x1xf32> to vector<6x350xf32>
    %407 = vector.broadcast %405 : vector<1x350xf32> to vector<6x350xf32>
    %408 = arith.mulf %406, %407 : vector<6x350xf32>
    %409 = arith.addf %402, %408 : vector<6x350xf32>
    %410 = vector.extract_strided_slice %0 {offsets = [0, 2], sizes = [6, 1], strides = [1, 1]} : vector<6x10xf32> to vector<6x1xf32>
    %c1_144 = arith.constant 1 : index
    %c20_145 = arith.constant 20 : index
    %c0_146 = arith.constant 0 : index
    %411 = vector.load %arg0[%c1_144, %c20_145, %c0_146] : memref<2x36x350xf32, #tpu.memory_space<vmem>>, vector<1x1x350xf32>
    %412 = vector.shape_cast %411 : vector<1x1x350xf32> to vector<1x350xf32>
    %413 = vector.broadcast %410 : vector<6x1xf32> to vector<6x350xf32>
    %414 = vector.broadcast %412 : vector<1x350xf32> to vector<6x350xf32>
    %415 = arith.mulf %413, %414 : vector<6x350xf32>
    %416 = arith.addf %409, %415 : vector<6x350xf32>
    %417 = vector.extract_strided_slice %0 {offsets = [0, 3], sizes = [6, 1], strides = [1, 1]} : vector<6x10xf32> to vector<6x1xf32>
    %c1_147 = arith.constant 1 : index
    %c21_148 = arith.constant 21 : index
    %c0_149 = arith.constant 0 : index
    %418 = vector.load %arg0[%c1_147, %c21_148, %c0_149] : memref<2x36x350xf32, #tpu.memory_space<vmem>>, vector<1x1x350xf32>
    %419 = vector.shape_cast %418 : vector<1x1x350xf32> to vector<1x350xf32>
    %420 = vector.broadcast %417 : vector<6x1xf32> to vector<6x350xf32>
    %421 = vector.broadcast %419 : vector<1x350xf32> to vector<6x350xf32>
    %422 = arith.mulf %420, %421 : vector<6x350xf32>
    %423 = arith.addf %416, %422 : vector<6x350xf32>
    %424 = vector.extract_strided_slice %0 {offsets = [0, 4], sizes = [6, 1], strides = [1, 1]} : vector<6x10xf32> to vector<6x1xf32>
    %c1_150 = arith.constant 1 : index
    %c22_151 = arith.constant 22 : index
    %c0_152 = arith.constant 0 : index
    %425 = vector.load %arg0[%c1_150, %c22_151, %c0_152] : memref<2x36x350xf32, #tpu.memory_space<vmem>>, vector<1x1x350xf32>
    %426 = vector.shape_cast %425 : vector<1x1x350xf32> to vector<1x350xf32>
    %427 = vector.broadcast %424 : vector<6x1xf32> to vector<6x350xf32>
    %428 = vector.broadcast %426 : vector<1x350xf32> to vector<6x350xf32>
    %429 = arith.mulf %427, %428 : vector<6x350xf32>
    %430 = arith.addf %423, %429 : vector<6x350xf32>
    %431 = vector.extract_strided_slice %0 {offsets = [0, 5], sizes = [6, 1], strides = [1, 1]} : vector<6x10xf32> to vector<6x1xf32>
    %c1_153 = arith.constant 1 : index
    %c23_154 = arith.constant 23 : index
    %c0_155 = arith.constant 0 : index
    %432 = vector.load %arg0[%c1_153, %c23_154, %c0_155] : memref<2x36x350xf32, #tpu.memory_space<vmem>>, vector<1x1x350xf32>
    %433 = vector.shape_cast %432 : vector<1x1x350xf32> to vector<1x350xf32>
    %434 = vector.broadcast %431 : vector<6x1xf32> to vector<6x350xf32>
    %435 = vector.broadcast %433 : vector<1x350xf32> to vector<6x350xf32>
    %436 = arith.mulf %434, %435 : vector<6x350xf32>
    %437 = arith.addf %430, %436 : vector<6x350xf32>
    %438 = vector.extract_strided_slice %0 {offsets = [0, 6], sizes = [6, 1], strides = [1, 1]} : vector<6x10xf32> to vector<6x1xf32>
    %c1_156 = arith.constant 1 : index
    %c24_157 = arith.constant 24 : index
    %c0_158 = arith.constant 0 : index
    %439 = vector.load %arg0[%c1_156, %c24_157, %c0_158] : memref<2x36x350xf32, #tpu.memory_space<vmem>>, vector<1x1x350xf32>
    %440 = vector.shape_cast %439 : vector<1x1x350xf32> to vector<1x350xf32>
    %441 = vector.broadcast %438 : vector<6x1xf32> to vector<6x350xf32>
    %442 = vector.broadcast %440 : vector<1x350xf32> to vector<6x350xf32>
    %443 = arith.mulf %441, %442 : vector<6x350xf32>
    %444 = arith.addf %437, %443 : vector<6x350xf32>
    %445 = vector.extract_strided_slice %0 {offsets = [0, 7], sizes = [6, 1], strides = [1, 1]} : vector<6x10xf32> to vector<6x1xf32>
    %c1_159 = arith.constant 1 : index
    %c25_160 = arith.constant 25 : index
    %c0_161 = arith.constant 0 : index
    %446 = vector.load %arg0[%c1_159, %c25_160, %c0_161] : memref<2x36x350xf32, #tpu.memory_space<vmem>>, vector<1x1x350xf32>
    %447 = vector.shape_cast %446 : vector<1x1x350xf32> to vector<1x350xf32>
    %448 = vector.broadcast %445 : vector<6x1xf32> to vector<6x350xf32>
    %449 = vector.broadcast %447 : vector<1x350xf32> to vector<6x350xf32>
    %450 = arith.mulf %448, %449 : vector<6x350xf32>
    %451 = arith.addf %444, %450 : vector<6x350xf32>
    %452 = vector.extract_strided_slice %0 {offsets = [0, 8], sizes = [6, 1], strides = [1, 1]} : vector<6x10xf32> to vector<6x1xf32>
    %c1_162 = arith.constant 1 : index
    %c26_163 = arith.constant 26 : index
    %c0_164 = arith.constant 0 : index
    %453 = vector.load %arg0[%c1_162, %c26_163, %c0_164] : memref<2x36x350xf32, #tpu.memory_space<vmem>>, vector<1x1x350xf32>
    %454 = vector.shape_cast %453 : vector<1x1x350xf32> to vector<1x350xf32>
    %455 = vector.broadcast %452 : vector<6x1xf32> to vector<6x350xf32>
    %456 = vector.broadcast %454 : vector<1x350xf32> to vector<6x350xf32>
    %457 = arith.mulf %455, %456 : vector<6x350xf32>
    %458 = arith.addf %451, %457 : vector<6x350xf32>
    %459 = arith.maximumf %396, %458 : vector<6x350xf32>
    %460 = vector.extract_strided_slice %0 {offsets = [0, 0], sizes = [6, 1], strides = [1, 1]} : vector<6x10xf32> to vector<6x1xf32>
    %c1_165 = arith.constant 1 : index
    %c27_166 = arith.constant 27 : index
    %c0_167 = arith.constant 0 : index
    %461 = vector.load %arg0[%c1_165, %c27_166, %c0_167] : memref<2x36x350xf32, #tpu.memory_space<vmem>>, vector<1x1x350xf32>
    %462 = vector.shape_cast %461 : vector<1x1x350xf32> to vector<1x350xf32>
    %463 = vector.broadcast %460 : vector<6x1xf32> to vector<6x350xf32>
    %464 = vector.broadcast %462 : vector<1x350xf32> to vector<6x350xf32>
    %465 = arith.mulf %463, %464 : vector<6x350xf32>
    %466 = vector.extract_strided_slice %0 {offsets = [0, 1], sizes = [6, 1], strides = [1, 1]} : vector<6x10xf32> to vector<6x1xf32>
    %c1_168 = arith.constant 1 : index
    %c28_169 = arith.constant 28 : index
    %c0_170 = arith.constant 0 : index
    %467 = vector.load %arg0[%c1_168, %c28_169, %c0_170] : memref<2x36x350xf32, #tpu.memory_space<vmem>>, vector<1x1x350xf32>
    %468 = vector.shape_cast %467 : vector<1x1x350xf32> to vector<1x350xf32>
    %469 = vector.broadcast %466 : vector<6x1xf32> to vector<6x350xf32>
    %470 = vector.broadcast %468 : vector<1x350xf32> to vector<6x350xf32>
    %471 = arith.mulf %469, %470 : vector<6x350xf32>
    %472 = arith.addf %465, %471 : vector<6x350xf32>
    %473 = vector.extract_strided_slice %0 {offsets = [0, 2], sizes = [6, 1], strides = [1, 1]} : vector<6x10xf32> to vector<6x1xf32>
    %c1_171 = arith.constant 1 : index
    %c29_172 = arith.constant 29 : index
    %c0_173 = arith.constant 0 : index
    %474 = vector.load %arg0[%c1_171, %c29_172, %c0_173] : memref<2x36x350xf32, #tpu.memory_space<vmem>>, vector<1x1x350xf32>
    %475 = vector.shape_cast %474 : vector<1x1x350xf32> to vector<1x350xf32>
    %476 = vector.broadcast %473 : vector<6x1xf32> to vector<6x350xf32>
    %477 = vector.broadcast %475 : vector<1x350xf32> to vector<6x350xf32>
    %478 = arith.mulf %476, %477 : vector<6x350xf32>
    %479 = arith.addf %472, %478 : vector<6x350xf32>
    %480 = vector.extract_strided_slice %0 {offsets = [0, 3], sizes = [6, 1], strides = [1, 1]} : vector<6x10xf32> to vector<6x1xf32>
    %c1_174 = arith.constant 1 : index
    %c30_175 = arith.constant 30 : index
    %c0_176 = arith.constant 0 : index
    %481 = vector.load %arg0[%c1_174, %c30_175, %c0_176] : memref<2x36x350xf32, #tpu.memory_space<vmem>>, vector<1x1x350xf32>
    %482 = vector.shape_cast %481 : vector<1x1x350xf32> to vector<1x350xf32>
    %483 = vector.broadcast %480 : vector<6x1xf32> to vector<6x350xf32>
    %484 = vector.broadcast %482 : vector<1x350xf32> to vector<6x350xf32>
    %485 = arith.mulf %483, %484 : vector<6x350xf32>
    %486 = arith.addf %479, %485 : vector<6x350xf32>
    %487 = vector.extract_strided_slice %0 {offsets = [0, 4], sizes = [6, 1], strides = [1, 1]} : vector<6x10xf32> to vector<6x1xf32>
    %c1_177 = arith.constant 1 : index
    %c31_178 = arith.constant 31 : index
    %c0_179 = arith.constant 0 : index
    %488 = vector.load %arg0[%c1_177, %c31_178, %c0_179] : memref<2x36x350xf32, #tpu.memory_space<vmem>>, vector<1x1x350xf32>
    %489 = vector.shape_cast %488 : vector<1x1x350xf32> to vector<1x350xf32>
    %490 = vector.broadcast %487 : vector<6x1xf32> to vector<6x350xf32>
    %491 = vector.broadcast %489 : vector<1x350xf32> to vector<6x350xf32>
    %492 = arith.mulf %490, %491 : vector<6x350xf32>
    %493 = arith.addf %486, %492 : vector<6x350xf32>
    %494 = vector.extract_strided_slice %0 {offsets = [0, 5], sizes = [6, 1], strides = [1, 1]} : vector<6x10xf32> to vector<6x1xf32>
    %c1_180 = arith.constant 1 : index
    %c32_181 = arith.constant 32 : index
    %c0_182 = arith.constant 0 : index
    %495 = vector.load %arg0[%c1_180, %c32_181, %c0_182] : memref<2x36x350xf32, #tpu.memory_space<vmem>>, vector<1x1x350xf32>
    %496 = vector.shape_cast %495 : vector<1x1x350xf32> to vector<1x350xf32>
    %497 = vector.broadcast %494 : vector<6x1xf32> to vector<6x350xf32>
    %498 = vector.broadcast %496 : vector<1x350xf32> to vector<6x350xf32>
    %499 = arith.mulf %497, %498 : vector<6x350xf32>
    %500 = arith.addf %493, %499 : vector<6x350xf32>
    %501 = vector.extract_strided_slice %0 {offsets = [0, 6], sizes = [6, 1], strides = [1, 1]} : vector<6x10xf32> to vector<6x1xf32>
    %c1_183 = arith.constant 1 : index
    %c33_184 = arith.constant 33 : index
    %c0_185 = arith.constant 0 : index
    %502 = vector.load %arg0[%c1_183, %c33_184, %c0_185] : memref<2x36x350xf32, #tpu.memory_space<vmem>>, vector<1x1x350xf32>
    %503 = vector.shape_cast %502 : vector<1x1x350xf32> to vector<1x350xf32>
    %504 = vector.broadcast %501 : vector<6x1xf32> to vector<6x350xf32>
    %505 = vector.broadcast %503 : vector<1x350xf32> to vector<6x350xf32>
    %506 = arith.mulf %504, %505 : vector<6x350xf32>
    %507 = arith.addf %500, %506 : vector<6x350xf32>
    %508 = vector.extract_strided_slice %0 {offsets = [0, 7], sizes = [6, 1], strides = [1, 1]} : vector<6x10xf32> to vector<6x1xf32>
    %c1_186 = arith.constant 1 : index
    %c34_187 = arith.constant 34 : index
    %c0_188 = arith.constant 0 : index
    %509 = vector.load %arg0[%c1_186, %c34_187, %c0_188] : memref<2x36x350xf32, #tpu.memory_space<vmem>>, vector<1x1x350xf32>
    %510 = vector.shape_cast %509 : vector<1x1x350xf32> to vector<1x350xf32>
    %511 = vector.broadcast %508 : vector<6x1xf32> to vector<6x350xf32>
    %512 = vector.broadcast %510 : vector<1x350xf32> to vector<6x350xf32>
    %513 = arith.mulf %511, %512 : vector<6x350xf32>
    %514 = arith.addf %507, %513 : vector<6x350xf32>
    %515 = vector.extract_strided_slice %0 {offsets = [0, 8], sizes = [6, 1], strides = [1, 1]} : vector<6x10xf32> to vector<6x1xf32>
    %c1_189 = arith.constant 1 : index
    %c35_190 = arith.constant 35 : index
    %c0_191 = arith.constant 0 : index
    %516 = vector.load %arg0[%c1_189, %c35_190, %c0_191] : memref<2x36x350xf32, #tpu.memory_space<vmem>>, vector<1x1x350xf32>
    %517 = vector.shape_cast %516 : vector<1x1x350xf32> to vector<1x350xf32>
    %518 = vector.broadcast %515 : vector<6x1xf32> to vector<6x350xf32>
    %519 = vector.broadcast %517 : vector<1x350xf32> to vector<6x350xf32>
    %520 = arith.mulf %518, %519 : vector<6x350xf32>
    %521 = arith.addf %514, %520 : vector<6x350xf32>
    %522 = arith.maximumf %459, %521 : vector<6x350xf32>
    %523 = vector.broadcast %1 : vector<6x1xf32> to vector<6x350xf32>
    %524 = arith.addf %522, %523 : vector<6x350xf32>
    %cst_192 = arith.constant 0.00999999977 : f32
    %525 = vector.broadcast %cst_192 : f32 to vector<6x350xf32>
    %526 = arith.mulf %525, %524 : vector<6x350xf32>
    %527 = arith.maximumf %524, %526 : vector<6x350xf32>
    %528 = arith.mulf %527, %2 : vector<6x350xf32>
    %cst_193 = arith.constant dense<0.000000e+00> : vector<6xf32>
    %529 = vector.multi_reduction <add>, %528, %cst_193 [1] : vector<6x350xf32> to vector<6xf32>
    %530 = vector.shape_cast %529 : vector<6xf32> to vector<6x1xf32>
    %cst_194 = arith.constant dense<0.000000e+00> : vector<1xf32>
    %531 = vector.multi_reduction <add>, %530, %cst_194 [0] : vector<6x1xf32> to vector<1xf32>
    %532 = vector.shape_cast %531 : vector<1xf32> to vector<1x1xf32>
    %533 = arith.mulf %527, %3 : vector<6x350xf32>
    %cst_195 = arith.constant dense<0.000000e+00> : vector<6xf32>
    %534 = vector.multi_reduction <add>, %533, %cst_195 [1] : vector<6x350xf32> to vector<6xf32>
    %535 = vector.shape_cast %534 : vector<6xf32> to vector<6x1xf32>
    %cst_196 = arith.constant dense<0.000000e+00> : vector<1xf32>
    %536 = vector.multi_reduction <add>, %535, %cst_196 [0] : vector<6x1xf32> to vector<1xf32>
    %537 = vector.shape_cast %536 : vector<1xf32> to vector<1x1xf32>
    %538 = tpu.concatenate %532, %537 in 1 : vector<1x1xf32>, vector<1x1xf32> -> vector<1x2xf32>
    %539 = tpu.concatenate %271, %538 in 0 : vector<1x2xf32>, vector<1x2xf32> -> vector<2x2xf32>
    %540 = vector.broadcast %4 : vector<1x2xf32> to vector<2x2xf32>
    %541 = arith.addf %539, %540 : vector<2x2xf32>
    %c0_197 = arith.constant 0 : index
    %c0_198 = arith.constant 0 : index
    %542 = vector.load %arg2[%c0_197, %c0_198] : memref<2x2xf32, #tpu.memory_space<vmem>>, vector<2x2xf32>
    tpu.vector_store %arg2[%c0_197, %c0_198], %541 {strides = array<i32>} : memref<2x2xf32, #tpu.memory_space<vmem>>, vector<2x2xf32>,
    return
  }
}

</mosaic_0001>

<bundles_post_ra>
// kernel: custom_net_forward.1
= control target key start
LH: loop header
LB: loop body
LE: loop exit
PB: predicated region body
PF: predicated region fallthrough
CT: control target
= control target key end

     0   :  { %v1403_v1 = vmov 0   ;;  %v1404_v2 = vmov 2   ;;  %s2363_s0 = inlined_call_operand.vmem [shape: f32[2,36,350], index: 0, kind: input, shape index: {}]   ;;  %s2364_s1 = inlined_call_operand.vmem [shape: f32[23,350], index: 1, kind: input, shape index: {}]   ;;  %s2365_s2 = inlined_call_operand.hbm [shape: f32[2,2], index: 2, kind: output, shape index: {}]  }
   0x1   :  { %v12_v0 = vld [vmem:[%s2364_s1 + $0x30] sm:$0x3f]  ;;  %1366 = vset.pattern.permute.xlu0 %v1403_v1  ;;  %1368 = vset.pattern.permute.xlu1 %v1404_v2 }
   0x2   :  { %7 = vsyncpa [#allocation3], 0  ;;  %23 = vperm.xlu0 %1366, %v12_v0   ;;  %58 = vperm.xlu1 %1368, %v12_v0   ;;  %v1405_v3 = vmov 4   ;;  %v1406_v4 = vmov 1   ;;  %v1407_v5 = vmov 3   ;;  %v1408_v6 = vmov 5  }
   0x3   :  { %1370 = vset.pattern.permute.xlu2 %v1405_v3  ;;  %v1409_v7 = vmov 6   ;;  %v1410_v8 = vmov 8   ;;  %v1411_v9 = vmov 7   ;;  %v1412_v10 = vmov 9   ;;  %s1413_s28 = smov [#allocation2]   ;;  %s1240_s4 = sshll.u32 %s2365_s2, 4  ;;  %s1241_s4 = int_to_ptr.hbm [resolvable:$true] %s1240_s4 }
   0x4   :  { %96 = vperm.xlu2 %1370, %v12_v0   ;;  %v1435_v11 = vld [vmem:[%s2363_s0 + $0x78] ss:$8 sm:$0x7]  ;;  %v1440_v12 = vld [vmem:[%s2363_s0 + $0x7a] ss:$8 sm:$0x7] }
   0x5   :  { %v1445_v13 = vld [vmem:[%s2363_s0 + $0x91] ss:$8 sm:$0x7]  ;;  %v647_v14 = vperm.slane %v1435_v11, 0  ;;  %v648_v15 = vperm.slane %v1435_v11, 1  ;;  %v649_v17 = vperm.slane %v1435_v11, 2 }
   0x6   :  { %v1323_v16 = vld [vmem:[%s2363_s0 + $0x7c] ss:$8 sm:$0x7]  ;;  %v674_v18 = vperm.slane %v1440_v12, 0  ;;  %v675_v19 = vperm.slane %v1440_v12, 1  ;;  %v676_v21 = vperm.slane %v1440_v12, 2 }
   0x7   :  { %v1458_v20 = vld [vmem:[%s2363_s0 + $0x93] ss:$8 sm:$0x7]  ;;  %v779_v22 = vperm.slane %v1445_v13, 0  ;;  %v780_v23 = vperm.slane %v1445_v13, 1  ;;  %v704_v25 = vperm.slane %v1323_v16, 0 }
   0x8   :  { %v1466_v24 = vld [vmem:[%s2363_s0 + $0xaa] ss:$8 sm:$0x7]  ;;  %v705_v26 = vperm.slane %v1323_v16, 1  ;;  %v781_v27 = vperm.slane %v1445_v13, 2  ;;  %v706_v30 = vperm.slane %v1323_v16, 2 }
   0x9   :  { %v1472_v28 = vld [vmem:[%s2363_s0 + $0x95] ss:$8 sm:$0x7]  ;;  %v1477_v29 = vld [vmem:[%s2363_s0 + $0x79] ss:$8 sm:$0x7] }
   0xa   :  { %1367 = vset.pattern.permute.xlu0 %v1406_v4  ;;  %1369 = vset.pattern.permute.xlu1 %v1407_v5  ;;  %v1486_v34 = vld [vmem:[%s2363_s0 + $0x7b] ss:$8 sm:$0x7]  ;;  %v1494_v38 = vld [vmem:[%s2363_s0 + $0x92] ss:$8 sm:$0x7] }
   0xb   :  { %39 = vperm.xlu0 %1367, %v12_v0   ;;  %77 = vperm.xlu1 %1369, %v12_v0   ;;  %v836_v39 = vperm.slane %v1472_v28, 0  ;;  %v837_v40 = vperm.slane %v1472_v28, 1  ;;  %v1324_v44 = vld [vmem:[%s2363_s0 + $0x7d] ss:$8 sm:$0x7]  ;;  %v838_v45 = vperm.slane %v1472_v28, 2 }
   0xc   :  { %1371 = vset.pattern.permute.xlu2 %v1408_v6  ;;  %v1511_v49 = vld [vmem:[%s2363_s0 + $0x94] ss:$8 sm:$0x7]  ;;  %v1519_v53 = vld [vmem:[%s2363_s0 + $0xab] ss:$8 sm:$0x7] }
   0xd   :  { %115 = vperm.xlu2 %1371, %v12_v0   ;;  %v719_v54 = vperm.slane %v1324_v44, 0  ;;  %v720_v55 = vperm.slane %v1324_v44, 1  ;;  %v1333_v57 = vld [vmem:[%s2363_s0 + $0x96] ss:$8 sm:$0x7]  ;;  %v721_v59 = vperm.slane %v1324_v44, 2 }
   0xe   :  { %v1533_v62 = vld [vmem:[%s2363_s0 + $0xac] ss:$8 sm:$0x7]  ;;  %v851_v5 = vperm.slane %v1333_v57, 0  ;;  %v852_v6 = vperm.slane %v1333_v57, 1  ;;  %v2398_v12 = vperm.slane %v1458_v20, 1 }
   0xf   :  { %v1341_v56 = vld [vmem:[%s2363_s0 + $0xae] ss:$8 sm:$0x7]  ;;  %v1625_v48 = vld [vmem:[%s2363_s0 + $0xa9] ss:$8 sm:$0x7] }
  0x10   :  { %v971_v44 = vperm.slane %v1341_v56, 0  ;;  %v972_v16 = vperm.slane %v1341_v56, 1  ;;  %v973_v41 = vperm.slane %v1341_v56, 2  ;;  %v1342_v46 = vld [vmem:[%s2363_s0 + $0xaf] ss:$8 sm:$0x7] }
  0x11   :  { %v1654_v56 = vld [vmem:[%s2363_s0 + $0xc4] ss:$8 sm:$0x7]  ;;  %v988_v37 = vperm.slane %v1342_v46, 2  ;;  %v2399_v35 = vperm.slane %v1458_v20, 2  ;;  %v2401_v13 = vperm.slane %v1466_v24, 1 }
  0x12   :  { %2390 = vst [vmem:[#allocation9_spill] sm:$0xff] %v1654_v56  ;;  %vm609_vm0 = vcmask 1045504   ;;  %vm613_vm1 = vcmask 766976   ;;  %vm642_vm2 = vcmask 7168   ;;  %vm1228_vm3 = vcmask 1040384   ;;  %s1238_s29 = sshll.u32 %s1413_s28, 4  ;;  %s1239_s29 = int_to_ptr.vmem [resolvable:$true] %s1238_s29 }
  0x13   :  { %1372 = vset.pattern.permute.xlu1 %v1409_v7  ;;  %1374 = vset.pattern.permute.xlu0 %v1410_v8  ;;  %v1553_v8 = vld [vmem:[%s2363_s0 + $0xc3] ss:$8 sm:$0x7]  ;;  %v1326_v7 = vld [vmem:[%s2363_s0 + $0x7f] ss:$8 sm:$0x7] }
  0x14   :  { %134 = vperm.xlu1 %1372, %v12_v0   ;;  %172 = vperm.xlu0 %1374, %v12_v0   ;;  %v750_v52 = vperm.slane %v1326_v7, 1  ;;  %v751_v51 = vperm.slane %v1326_v7, 2  ;;  %vm1231_vm4 = vcmask 9216  }
  0x15   :  { %1373 = vset.pattern.permute.xlu2 %v1411_v9 }
  0x16   :  { %153 = vperm.xlu2 %1373, %v12_v0  }
  0x1c   :  { %1375 = vset.pattern.permute.xlu1 %v1412_v10  ;;  %1376 = vset.pattern.permute.xlu0 %v1412_v10  ;;  %v853_v10 = vperm.slane %v1333_v57, 2  ;;  %v1572_v57 = vld [vmem:[%s2363_s0 + $0x90] ss:$8 sm:$0x7] }
  0x1d   :  { %594 = vperm.xlu1 %1375, %v12_v0   ;;  %v1541_v0 = vld [vmem:[%s2363_s0 + $0x7e] ss:$8 sm:$0x7] }
  0x5e   :  { %v1481_v33 = vpop.permute.xlu2 %96 }
  0x5f   :  { %2386 = vst [vmem:[#allocation5_spill] sm:$0xff] %v1481_v33  ;;  %v1526_v58 = vmul.f32 %v704_v25, %v1481_v33  ;;  %v1536_v63 = vmul.f32 %v705_v26, %v1481_v33  ;;  %v1547_v4 = vmul.f32 %v706_v30, %v1481_v33  ;;  %v1567_v3 = vmul.f32 %v836_v39, %v1481_v33  ;;  %v1671_v25 = vld [vmem:[%s2363_s0 + $0xc5] ss:$8 sm:$0x7] }
  0x60   :  { %v1575_v2 = vmul.f32 %v837_v40, %v1481_v33  ;;  %v1590_v60 = vmul.f32 %v838_v45, %v1481_v33  ;;  %v1595_v40 = vld [vmem:[%s2363_s0 + $0x97] ss:$8 sm:$0x7]  ;;  %v1335_v45 = vld [vmem:[%s2363_s0 + $0xa8] ss:$8 sm:$0x7]  ;;  %v1674_v26 = vmul.f32 %v973_v41, %v1481_v33 }
  0x61   :  { %v882_v50 = vperm.slane %v1335_v45, 1  ;;  %v883_v42 = vperm.slane %v1335_v45, 2  ;;  %2393 = vst [vmem:[#allocation12_spill] sm:$0xff] %v1671_v25  ;;  %v986_v30 = vperm.slane %v1342_v46, 0 }
  0x62   :  { %2394 = vst [vmem:[#allocation13_spill] sm:$0xff] %v1674_v26 }
  0x67   :  { %v1555_v9 = vpop.permute.xlu2 %115 }
  0x68   :  { %2387 = vst [vmem:[#allocation6_spill] sm:$0xff] %v1555_v9  ;;  %v1581_v1 = vmul.f32 %v719_v54, %v1555_v9  ;;  %v1584_v39 = vmul.f32 %v720_v55, %v1555_v9  ;;  %v1587_v61 = vmul.f32 %v721_v59, %v1555_v9  ;;  %v749_v54 = vperm.slane %v1326_v7, 0  ;;  %v1615_v7 = vld [vmem:[%s2363_s0 + $0xad] ss:$8 sm:$0x7] }
  0x69   :  { %v1601_v55 = vmul.f32 %v851_v5, %v1555_v9  ;;  %v1610_v47 = vmul.f32 %v852_v6, %v1555_v9  ;;  %2388 = vst [vmem:[#allocation7_spill] sm:$0xff] %v1615_v7  ;;  %v1618_v5 = vmul.f32 %v853_v10, %v1555_v9  ;;  %v881_v59 = vperm.slane %v1335_v45, 0 }
  0x6a   :  { %v1756_v56 = vmul.f32 %v986_v30, %v1555_v9  ;;  %v1762_v26 = vmul.f32 %v988_v37, %v1555_v9  ;;  %v1778_v37 = vld [vmem:[%s2363_s0 + $0xc2] ss:$8 sm:$0x7] }
  0x6b   :  { %2415 = vst [vmem:[#allocation24_spill] sm:$0xff] %v1778_v37 }
  0x6c   :  { %2410 = vst [vmem:[#allocation20_spill] sm:$0xff] %v1756_v56 }
  0x6d   :  { %2412 = vst [vmem:[#allocation22_spill] sm:$0xff] %v1762_v26 }
  0x70   :  { %v1632_v43 = vpop.permute.xlu2 %153 }
  0x71   :  { %2389 = vst [vmem:[#allocation8_spill] sm:$0xff] %v1632_v43  ;;  %v1637_v6 = vmul.f32 %v749_v54, %v1632_v43  ;;  %v1640_v45 = vmul.f32 %v750_v52, %v1632_v43  ;;  %v1643_v10 = vmul.f32 %v751_v51, %v1632_v43  ;;  %v1646_v28 = vmul.f32 %v881_v59, %v1632_v43 }
  0x72   :  { %v1657_v54 = vmul.f32 %v882_v50, %v1632_v43  ;;  %v1660_v52 = vmul.f32 %v883_v42, %v1632_v43  ;;  %v1663_v51 = vmul.f32 %v971_v44, %v1481_v33  ;;  %v1666_v59 = vmul.f32 %v972_v16, %v1481_v33 }
  0x73   :  { %v987_v50 = vperm.slane %v1342_v46, 1  ;;  %v2400_v44 = vperm.slane %v1466_v24, 0 }
  0x74   :  { %2391 = vst [vmem:[#allocation10_spill] sm:$0xff] %v1663_v51  ;;  %v1676_v36 = vpop.permute.xlu0 %23  ;;  %v1678_v42 = vpop.permute.xlu1 %58 }
  0x75   :  { %2392 = vst [vmem:[#allocation11_spill] sm:$0xff] %v1666_v59  ;;  %v653_v41 = vmul.f32 %v647_v14, %v1676_v36  ;;  %v654_v46 = vmul.f32 %v648_v15, %v1676_v36  ;;  %v655_v31 = vmul.f32 %v649_v17, %v1676_v36  ;;  %v680_v16 = vmul.f32 %v674_v18, %v1678_v42 }
  0x76   :  { %2395 = vst [vmem:[#allocation14_spill] sm:$0xff] %v1676_v36  ;;  %v681_v32 = vmul.f32 %v675_v19, %v1678_v42  ;;  %v682_v14 = vmul.f32 %v676_v21, %v1678_v42  ;;  %v785_v15 = vmul.f32 %v779_v22, %v1676_v36  ;;  %v786_v11 = vmul.f32 %v780_v23, %v1676_v36 }
  0x77   :  { %2396 = vst [vmem:[#allocation15_spill] sm:$0xff] %v1678_v42  ;;  %v787_v17 = vmul.f32 %v781_v27, %v1676_v36  ;;  %v2397_v18 = vperm.slane %v1458_v20, 0  ;;  %v813_v21 = vmul.f32 %v2398_v12, %v1678_v42  ;;  %v814_v22 = vmul.f32 %v2399_v35, %v1678_v42  ;;  %v1743_v35 = vld [vmem:[%s2363_s0 + $0xc0] ss:$8 sm:$0x7] }
  0x78   :  { %v1723_v23 = vmul.f32 %v2400_v44, %v1676_v36  ;;  %v1728_v27 = vmul.f32 %v2401_v13, %v1676_v36  ;;  %v2403_v12 = vperm.slane %v1533_v62, 0  ;;  %2405 = vst [vmem:[#allocation17_spill] sm:$0xff] %v1743_v35  ;;  %v2406_v44 = vperm.slane %v1533_v62, 1 }
  0x79   :  { %v812_v19 = vmul.f32 %v2397_v18, %v1678_v42  ;;  %v2402_v18 = vperm.slane %v1466_v24, 2  ;;  %v2408_v24 = vperm.slane %v1533_v62, 2  ;;  %v1344_v62 = vld [vmem:[%s2363_s0 + $0xc1] ss:$8 sm:$0x7]  ;;  %v2418_v59 = vperm.slane %v1553_v8, 2 }
  0x7a   :  { %v1738_v20 = vmul.f32 %v2403_v12, %v1678_v42  ;;  %v1748_v13 = vmul.f32 %v2406_v44, %v1678_v42  ;;  %v1759_v12 = vmul.f32 %v987_v50, %v1555_v9  ;;  %v1018_v30 = vperm.slane %v1344_v62, 2 }
  0x7b   :  { %v1733_v33 = vmul.f32 %v2402_v18, %v1676_v36  ;;  %v1753_v18 = vmul.f32 %v2408_v24, %v1678_v42  ;;  %v1016_v24 = vperm.slane %v1344_v62, 0  ;;  %v1017_v42 = vperm.slane %v1344_v62, 1 }
  0x7c   :  { %2404 = vst [vmem:[#allocation16_spill] sm:$0xff] %v1738_v20  ;;  %v2413_v50 = vperm.slane %v1553_v8, 0  ;;  %v2416_v44 = vperm.slane %v1553_v8, 1  ;;  %v1788_v9 = vmul.f32 %v2418_v59, %v1676_v36  ;;  %v2423_v59 = vperm.slane %v1477_v29, 0 }
  0x7d   :  { %2407 = vst [vmem:[#allocation18_spill] sm:$0xff] %v1748_v13  ;;  %v1794_v26 = vpop.permute.xlu1 %77  ;;  %v1797_v56 = vmul.f32 %v1016_v24, %v1632_v43  ;;  %v1800_v35 = vmul.f32 %v1017_v42, %v1632_v43  ;;  %v2425_v24 = vperm.slane %v1477_v29, 2  ;;  %v2426_v42 = vperm.slane %v1486_v34, 0 }
  0x7e   :  { %2409 = vst [vmem:[#allocation19_spill] sm:$0xff] %v1753_v18  ;;  %v1783_v51 = vmul.f32 %v2416_v44, %v1676_v36  ;;  %v1803_v44 = vmul.f32 %v1018_v30, %v1632_v43  ;;  %v2427_v30 = vperm.slane %v1486_v34, 1  ;;  %v2428_v43 = vperm.slane %v1486_v34, 2 }
  0x7f   :  { %2411 = vst [vmem:[#allocation21_spill] sm:$0xff] %v1759_v12  ;;  %v1773_v12 = vmul.f32 %v2413_v50, %v1676_v36  ;;  %v2424_v50 = vperm.slane %v1477_v29, 1  ;;  %v2430_v29 = vperm.slane %v1494_v38, 1  ;;  %v2432_v34 = vperm.slane %v1511_v49, 0 }
  0x80   :  { %2417 = vst [vmem:[#allocation25_spill] sm:$0xff] %v1783_v51  ;;  %v696_v8 = vmul.f32 %v2427_v30, %v1794_v26 }
  0x81   :  { %2414 = vst [vmem:[#allocation23_spill] sm:$0xff] %v1773_v12  ;;  %v1792_v12 = vpop.permute.xlu0 %39 }
  0x82   :  { %2419 = vst [vmem:[#allocation26_spill] sm:$0xff] %v1788_v9  ;;  %v665_v62 = vmul.f32 %v2423_v59, %v1792_v12  ;;  %v666_v36 = vmul.f32 %v2424_v50, %v1792_v12  ;;  %v697_v59 = vmul.f32 %v2428_v43, %v1794_v26  ;;  %v827_v43 = vmul.f32 %v2432_v34, %v1794_v26 }
  0x83   :  { %2420 = vst [vmem:[#allocation27_spill] sm:$0xff] %v1797_v56  ;;  %v667_v56 = vmul.f32 %v2425_v24, %v1792_v12  ;;  %v798_v24 = vmul.f32 %v2430_v29, %v1792_v12 }
  0x84   :  { %2421 = vst [vmem:[#allocation28_spill] sm:$0xff] %v1800_v35  ;;  %v695_v35 = vmul.f32 %v2426_v42, %v1794_v26  ;;  %v668_v9 = vadd.f32 %v665_v62, %v653_v41  ;;  %v669_v25 = vadd.f32 %v666_v36, %v654_v46  ;;  %v2431_v42 = vperm.slane %v1494_v38, 2 }
  0x85   :  { %2422 = vst [vmem:[#allocation29_spill] sm:$0xff] %v1803_v44  ;;  %v2429_v44 = vperm.slane %v1494_v38, 0  ;;  %v670_v51 = vadd.f32 %v667_v56, %v655_v31  ;;  %v801_v18 = vadd.f32 %v798_v24, %v786_v11  ;;  %v2434_v38 = vperm.slane %v1511_v49, 2 }
  0x86   :  { %v799_v37 = vmul.f32 %v2431_v42, %v1792_v12  ;;  %v683_v20 = vadd.f32 %v680_v16, %v668_v9  ;;  %v684_v7 = vadd.f32 %v681_v32, %v669_v25  ;;  %v2435_v46 = vperm.slane %v1519_v53, 0 }
  0x87   :  { %v797_v50 = vmul.f32 %v2429_v44, %v1792_v12  ;;  %v2433_v44 = vperm.slane %v1511_v49, 1  ;;  %v685_v29 = vadd.f32 %v682_v14, %v670_v51  ;;  %v816_v31 = vadd.f32 %v813_v21, %v801_v18  ;;  %v1851_v49 = vpop.permute.xlu1 %134 }
  0x88   :  { %v802_v41 = vadd.f32 %v799_v37, %v787_v17  ;;  %v829_v56 = vmul.f32 %v2434_v38, %v1794_v26  ;;  %v698_v11 = vadd.f32 %v695_v35, %v683_v20  ;;  %v699_v62 = vadd.f32 %v696_v8, %v684_v7 }
  0x89   :  { %v800_v30 = vadd.f32 %v797_v50, %v785_v15  ;;  %v828_v13 = vmul.f32 %v2433_v44, %v1794_v26  ;;  %v932_v15 = vmul.f32 %v2435_v46, %v1792_v12  ;;  %v700_v50 = vadd.f32 %v697_v59, %v685_v29  ;;  %v1853_v16 = vpop.permute.xlu0 %172 }
  0x8a   :  { %v817_v24 = vadd.f32 %v814_v22, %v802_v41  ;;  %v2436_v32 = vperm.slane %v1519_v53, 1  ;;  %v2437_v25 = vperm.slane %v1519_v53, 2  ;;  %v713_v14 = vadd.f32 %v1526_v58, %v698_v11 }
  0x8b   :  { %v815_v36 = vadd.f32 %v812_v19, %v800_v30  ;;  %v831_v34 = vadd.f32 %v828_v13, %v816_v31  ;;  %v714_v7 = vadd.f32 %v1536_v63, %v699_v62  ;;  %v715_v17 = vadd.f32 %v1547_v4, %v700_v50 }
  0x8c   :  { %v933_v9 = vmul.f32 %v2436_v32, %v1792_v12  ;;  %v934_v51 = vmul.f32 %v2437_v25, %v1792_v12  ;;  %v832_v19 = vadd.f32 %v829_v56, %v817_v24  ;;  %v2438_v21 = vperm.slane %v1541_v0, 0 }
  0x8d   :  { %v830_v42 = vadd.f32 %v827_v43, %v815_v36  ;;  %v2439_v20 = vperm.slane %v1541_v0, 1  ;;  %v2440_v35 = vperm.slane %v1541_v0, 2  ;;  %v2441_v58 = vperm.slane %v1572_v57, 0 }
  0x8e   :  { %v740_v22 = vmul.f32 %v2438_v21, %v1851_v49  ;;  %v728_v63 = vadd.f32 %v1581_v1, %v713_v14  ;;  %v729_v4 = vadd.f32 %v1584_v39, %v714_v7  ;;  %v730_v37 = vadd.f32 %v1587_v61, %v715_v17 }
  0x8f   :  { %v741_v53 = vmul.f32 %v2439_v20, %v1851_v49  ;;  %v742_v13 = vmul.f32 %v2440_v35, %v1851_v49  ;;  %v770_v18 = vmul.f32 %v2441_v58, %v1853_v16  ;;  %v2442_v8 = vperm.slane %v1572_v57, 1 }
  0x90   :  { %v2443_v30 = vperm.slane %v1572_v57, 2  ;;  %v845_v0 = vadd.f32 %v1567_v3, %v830_v42  ;;  %v846_v44 = vadd.f32 %v1575_v2, %v831_v34  ;;  %v847_v29 = vadd.f32 %v1590_v60, %v832_v19 }
  0x91   :  { %v771_v59 = vmul.f32 %v2442_v8, %v1853_v16  ;;  %v743_v41 = vadd.f32 %v740_v22, %v728_v63  ;;  %v744_v1 = vadd.f32 %v741_v53, %v729_v4  ;;  %v745_v36 = vadd.f32 %v742_v13, %v730_v37  ;;  %v2450_v22 = vld [vmem:[#allocation7_spill] sm:$0xff]  ;;  %v2457_v37 = vld [vmem:[#allocation17_spill] sm:$0xff] }
  0x92   :  { %v772_v43 = vmul.f32 %v2443_v30, %v1853_v16  ;;  %v2444_v61 = vperm.slane %v1595_v40, 0  ;;  %v860_v31 = vadd.f32 %v1601_v55, %v845_v0  ;;  %v861_v38 = vadd.f32 %v1610_v47, %v846_v44 }
  0x93   :  { %v862_v57 = vadd.f32 %v1618_v5, %v847_v29  ;;  %v2445_v3 = vperm.slane %v1595_v40, 1  ;;  %v758_v2 = vadd.f32 %v1637_v6, %v743_v41  ;;  %v759_v60 = vadd.f32 %v1640_v45, %v744_v1  ;;  %v2460_v41 = vld [vmem:[#allocation10_spill] sm:$0xff] }
  0x94   :  { %v872_v39 = vmul.f32 %v2444_v61, %v1851_v49  ;;  %v760_v46 = vadd.f32 %v1643_v10, %v745_v36  ;;  %v2446_v11 = vperm.slane %v1595_v40, 2  ;;  %v2447_v47 = vperm.slane %v1625_v48, 0 }
  0x95   :  { %v873_v56 = vmul.f32 %v2445_v3, %v1851_v49  ;;  %v2448_v24 = vperm.slane %v1625_v48, 1  ;;  %v1903_v34 = vadd.f32 %v770_v18, %v758_v2  ;;  %v1905_v6 = vadd.f32 %v771_v59, %v759_v60  ;;  %v2455_v18 = vld [vmem:[#allocation19_spill] sm:$0xff] }
  0x96   :  { %v874_v62 = vmul.f32 %v2446_v11, %v1851_v49  ;;  %v875_v50 = vadd.f32 %v872_v39, %v860_v31  ;;  %v902_v5 = vmul.f32 %v2447_v47, %v1853_v16  ;;  %v1907_v45 = vadd.f32 %v772_v43, %v760_v46  ;;  %v2462_v39 = vld [vmem:[#allocation24_spill] sm:$0xff]  ;;  %v2466_v11 = vld [vmem:[#allocation9_spill] sm:$0xff] }
  0x97   :  { %v876_v55 = vadd.f32 %v873_v56, %v861_v38  ;;  %v903_v42 = vmul.f32 %v2448_v24, %v1853_v16  ;;  %v2449_v25 = vperm.slane %v1625_v48, 2  ;;  %v935_v7 = vadd.f32 %v932_v15, %v1723_v23  ;;  %v2454_v15 = vld [vmem:[#allocation18_spill] sm:$0xff]  ;;  %v2464_v56 = vld [vmem:[#allocation13_spill] sm:$0xff] }
  0x98   :  { %v877_v10 = vadd.f32 %v874_v62, %v862_v57  ;;  %v890_v40 = vadd.f32 %v1646_v28, %v875_v50  ;;  %v936_v19 = vadd.f32 %v933_v9, %v1728_v27  ;;  %v937_v21 = vadd.f32 %v934_v51, %v1733_v33  ;;  %v2463_v57 = vld [vmem:[#allocation11_spill] sm:$0xff] }
  0x99   :  { %v891_v32 = vadd.f32 %v1657_v54, %v876_v55  ;;  %v904_v14 = vmul.f32 %v2449_v25, %v1853_v16  ;;  %v2451_v20 = vperm.slane %v2450_v22, 0  ;;  %v2452_v54 = vld [vmem:[#allocation16_spill] sm:$0xff]  ;;  %v2453_v48 = vperm.slane %v2450_v22, 1 }
  0x9a   :  { %v892_v17 = vadd.f32 %v1660_v52, %v877_v10  ;;  %v905_v35 = vadd.f32 %v902_v5, %v890_v40  ;;  %v950_v13 = vadd.f32 %v2452_v54, %v935_v7  ;;  %v951_v52 = vadd.f32 %v2454_v15, %v936_v19  ;;  %v2468_v55 = vld [vmem:[#allocation20_spill] sm:$0xff]  ;;  %v2471_v10 = vld [vmem:[#allocation22_spill] sm:$0xff] }
  0x9b   :  { %v962_v53 = vmul.f32 %v2451_v20, %v1794_v26  ;;  %v1921_v28 = vadd.f32 %v903_v42, %v891_v32  ;;  %v963_v58 = vmul.f32 %v2453_v48, %v1794_v26  ;;  %v952_v27 = vadd.f32 %v2455_v18, %v937_v21  ;;  %v2474_v21 = vld [vmem:[#allocation25_spill] sm:$0xff]  ;;  %v2475_v20 = vld [vmem:[#allocation15_spill] sm:$0xff] }
  0x9c   :  { %v907_v23 = vadd.f32 %v904_v14, %v892_v17  ;;  %v2456_v33 = vperm.slane %v2450_v22, 2  ;;  %v908_v51 = vmax.f32 %v1903_v34, %v905_v35  ;;  %v2458_v8 = vperm.slane %v2457_v37, 0  ;;  %v2473_v14 = vld [vmem:[#allocation23_spill] sm:$0xff] }
  0x9d   :  { %v909_v63 = vmax.f32 %v1905_v6, %v1921_v28  ;;  %v965_v4 = vadd.f32 %v962_v53, %v950_v13  ;;  %v966_v43 = vadd.f32 %v963_v58, %v951_v52  ;;  %v2459_v44 = vperm.slane %v2457_v37, 1  ;;  %v2470_v6 = vld [vmem:[#allocation21_spill] sm:$0xff]  ;;  %v2476_v53 = vld [vmem:[#allocation12_spill] sm:$0xff] }
  0x9e   :  { %v964_v9 = vmul.f32 %v2456_v33, %v1794_v26  ;;  %v1007_v59 = vmul.f32 %v2458_v8, %v1851_v49  ;;  %v910_v30 = vmax.f32 %v1907_v45, %v907_v23  ;;  %v2461_v36 = vperm.slane %v2457_v37, 2  ;;  %v1349_v17 = vld [vmem:[%s2363_s0 + $0xc6] ss:$8 sm:$0x7] }
  0x9f   :  { %v1008_v29 = vmul.f32 %v2459_v44, %v1851_v49  ;;  %v980_v1 = vadd.f32 %v2460_v41, %v965_v4  ;;  %v1032_v31 = vperm.slane %v2462_v39, 1  ;;  %v1033_v38 = vperm.slane %v2462_v39, 2  ;;  %v2479_v23 = vld [vmem:[#allocation26_spill] sm:$0xff]  ;;  %v2481_v33 = vld [vmem:[#allocation27_spill] sm:$0xff] }
  0xa0   :  { %v967_v0 = vadd.f32 %v964_v9, %v952_v27  ;;  %v1009_v61 = vmul.f32 %v2461_v36, %v1851_v49  ;;  %v981_v3 = vadd.f32 %v2463_v57, %v966_v43  ;;  %v2465_v60 = vperm.slane %v2462_v39, 0  ;;  %v1350_v27 = vld [vmem:[%s2363_s0 + $0xc7] ss:$8 sm:$0x7] }
  0xa1   :  { %v2467_v62 = vperm.slane %v2466_v11, 0  ;;  %v995_v47 = vadd.f32 %v2468_v55, %v980_v1  ;;  %v1038_v5 = vmul.f32 %v1032_v31, %v1853_v16  ;;  %v1039_v24 = vmul.f32 %v1033_v38, %v1853_v16 }
  0xa2   :  { %v982_v2 = vadd.f32 %v2464_v56, %v967_v0  ;;  %v1037_v46 = vmul.f32 %v2465_v60, %v1853_v16  ;;  %v2469_v42 = vperm.slane %v2466_v11, 1  ;;  %v996_v45 = vadd.f32 %v2470_v6, %v981_v3  ;;  %v2483_v0 = vld [vmem:[#allocation29_spill] sm:$0xff] }
  0xa3   :  { %v1067_v50 = vmul.f32 %v2467_v62, %v1792_v12  ;;  %v2472_v32 = vperm.slane %v2466_v11, 2  ;;  %v1010_v19 = vadd.f32 %v1007_v59, %v995_v47  ;;  %v2477_v35 = vperm.slane %v2476_v53, 0  ;;  %v2482_v59 = vld [vmem:[#allocation28_spill] sm:$0xff] }
  0xa4   :  { %v1068_v34 = vmul.f32 %v2469_v42, %v1792_v12  ;;  %v997_v40 = vadd.f32 %v2471_v10, %v982_v2  ;;  %v2478_v54 = vperm.slane %v2476_v53, 1  ;;  %v1011_v48 = vadd.f32 %v1008_v29, %v996_v45  ;;  %v1351_v56 = vld [vmem:[%s2363_s0 + $0xd8] ss:$8 sm:$0x7] }
  0xa5   :  { %v1069_v25 = vmul.f32 %v2472_v32, %v1792_v12  ;;  %v1070_v7 = vadd.f32 %v1067_v50, %v2473_v14  ;;  %v1082_v28 = vmul.f32 %v2477_v35, %v2475_v20  ;;  %v2480_v52 = vperm.slane %v2476_v53, 2  ;;  %v2485_v14 = vld [vmem:[#allocation6_spill] sm:$0xff] }
  0xa6   :  { %v1071_v22 = vadd.f32 %v1068_v34, %v2474_v21  ;;  %v1083_v13 = vmul.f32 %v2478_v54, %v2475_v20  ;;  %v1012_v58 = vadd.f32 %v1009_v61, %v997_v40  ;;  %v1025_v9 = vadd.f32 %v2481_v33, %v1010_v19  ;;  %v1354_v35 = vld [vmem:[%s2363_s0 + $0xdb] ss:$8 sm:$0x7] }
  0xa7   :  { %v1072_v15 = vadd.f32 %v1069_v25, %v2479_v23  ;;  %v1084_v18 = vmul.f32 %v2480_v52, %v2475_v20  ;;  %v1085_v4 = vadd.f32 %v1082_v28, %v1070_v7  ;;  %v1091_v8 = vperm.slane %v1349_v17, 0  ;;  %v2486_v33 = vld [vmem:[#allocation8_spill] sm:$0xff] }
  0xa8   :  { %v1086_v37 = vadd.f32 %v1083_v13, %v1071_v22  ;;  %v1026_v43 = vadd.f32 %v2482_v59, %v1011_v48  ;;  %v1027_v44 = vadd.f32 %v2483_v0, %v1012_v58  ;;  %v1092_v41 = vperm.slane %v1349_v17, 1 }
  0xa9   :  { %v1087_v29 = vadd.f32 %v1084_v18, %v1072_v15  ;;  %v1040_v1 = vadd.f32 %v1037_v46, %v1025_v9  ;;  %v1093_v36 = vperm.slane %v1349_v17, 2  ;;  %v1097_v61 = vmul.f32 %v1091_v8, %v1794_v26  ;;  %v1352_v46 = vld [vmem:[%s2363_s0 + $0xd9] ss:$8 sm:$0x7] }
  0xaa   :  { %v1106_v39 = vperm.slane %v1350_v27, 0  ;;  %v1041_v31 = vadd.f32 %v1038_v5, %v1026_v43  ;;  %v1042_v38 = vadd.f32 %v1039_v24, %v1027_v44  ;;  %v1098_v57 = vmul.f32 %v1092_v41, %v1794_v26  ;;  %v2484_v5 = vld [vmem:[#allocation5_spill] sm:$0xff] }
  0xab   :  { %v1107_v3 = vperm.slane %v1350_v27, 1  ;;  %v1993_v2 = vmax.f32 %v908_v51, %v1040_v1  ;;  %v1099_v60 = vmul.f32 %v1093_v36, %v1794_v26  ;;  %v1100_v11 = vadd.f32 %v1097_v61, %v1085_v4  ;;  %v20_v18 = vld [vmem:[%s2363_s0] ss:$8 sm:$0x7] }
  0xac   :  { %v1108_v62 = vperm.slane %v1350_v27, 2  ;;  %v1999_v50 = vmax.f32 %v909_v63, %v1041_v31  ;;  %v2001_v55 = vmax.f32 %v910_v30, %v1042_v38  ;;  %v1101_v47 = vadd.f32 %v1098_v57, %v1086_v37  ;;  %v1353_v63 = vld [vmem:[%s2363_s0 + $0xda] ss:$8 sm:$0x7] }
  0xad   :  { %v1112_v24 = vmul.f32 %v1106_v39, %v2484_v5  ;;  %v1102_v42 = vadd.f32 %v1099_v60, %v1087_v29  ;;  %v1113_v34 = vmul.f32 %v1107_v3, %v2484_v5  ;;  %v1121_v6 = vperm.slane %v1351_v56, 0  ;;  %v1284_v36 = vld [vmem:[%s2363_s0 + $0x1] ss:$8 sm:$0x7] }
  0xae   :  { %v1114_v51 = vmul.f32 %v1108_v62, %v2484_v5  ;;  %v1122_v10 = vperm.slane %v1351_v56, 1  ;;  %v1123_v40 = vperm.slane %v1351_v56, 2  ;;  %v1136_v32 = vperm.slane %v1352_v46, 0  ;;  %v2487_v60 = vld [vmem:[#allocation14_spill] sm:$0xff] }
  0xaf   :  { %v1115_v45 = vadd.f32 %v1112_v24, %v1100_v11  ;;  %v1116_v25 = vadd.f32 %v1113_v34, %v1101_v47  ;;  %v1127_v7 = vmul.f32 %v1121_v6, %v2485_v14  ;;  %v1137_v17 = vperm.slane %v1352_v46, 1  ;;  %v1285_v62 = vld [vmem:[%s2363_s0 + $0x2] ss:$8 sm:$0x7] }
  0xb0   :  { %v1117_v30 = vadd.f32 %v1114_v51, %v1102_v42  ;;  %v1128_v19 = vmul.f32 %v1122_v10, %v2485_v14  ;;  %v1129_v21 = vmul.f32 %v1123_v40, %v2485_v14  ;;  %v1138_v22 = vperm.slane %v1352_v46, 2  ;;  %v2034_v46 = vpop.permute.xlu1 %594 }
  0xb1   :  { %v1142_v53 = vmul.f32 %v1136_v32, %v1851_v49  ;;  %v1130_v28 = vadd.f32 %v1127_v7, %v1115_v45  ;;  %v1143_v54 = vmul.f32 %v1137_v17, %v1851_v49  ;;  %v1151_v13 = vperm.slane %v1353_v63, 0 }
  0xb2   :  { %v1152_v48 = vperm.slane %v1353_v63, 1  ;;  %v1131_v58 = vadd.f32 %v1128_v19, %v1116_v25  ;;  %v1132_v23 = vadd.f32 %v1129_v21, %v1117_v30  ;;  %v1144_v15 = vmul.f32 %v1138_v22, %v1851_v49 }
  0xb3   :  { %v1153_v52 = vperm.slane %v1353_v63, 2  ;;  %v1145_v27 = vadd.f32 %v1142_v53, %v1130_v28  ;;  %v1157_v9 = vmul.f32 %v1151_v13, %v2486_v33  ;;  %v1166_v37 = vperm.slane %v1354_v35, 0 }
  0xb4   :  { %v1158_v4 = vmul.f32 %v1152_v48, %v2486_v33  ;;  %v1146_v8 = vadd.f32 %v1143_v54, %v1131_v58  ;;  %v1147_v59 = vadd.f32 %v1144_v15, %v1132_v23  ;;  %v1167_v0 = vperm.slane %v1354_v35, 1  ;;  %v2064_v23 = vld [vmem:[%s2364_s1] sm:$0x3f] }
  0xb5   :  { %v1159_v43 = vmul.f32 %v1153_v52, %v2486_v33  ;;  %v1160_v44 = vadd.f32 %v1157_v9, %v1145_v27  ;;  %v1168_v29 = vperm.slane %v1354_v35, 2  ;;  %v1172_v41 = vmul.f32 %v1166_v37, %v1853_v16  ;;  %v2052_v35 = vld [vmem:[%s2364_s1 + $0x18] sm:$0x3f] }
  0xb6   :  { %v27_v1 = vperm.slane %v20_v18, 0  ;;  %v1161_v61 = vadd.f32 %v1158_v4, %v1146_v8  ;;  %v1173_v31 = vmul.f32 %v1167_v0, %v1853_v16  ;;  %v28_v38 = vperm.slane %v20_v18, 1  ;;  %v2071_v4 = vld [vmem:[%s2364_s1 + $0x8] sm:$0x3f]  ;;  %v2081_v0 = vld [vmem:[%s2364_s1 + $0x10] sm:$0x3f] }
  0xb7   :  { %v1162_v39 = vadd.f32 %v1159_v43, %v1147_v59  ;;  %v1174_v57 = vmul.f32 %v1168_v29, %v1853_v16  ;;  %v1175_v3 = vadd.f32 %v1172_v41, %v1160_v44  ;;  %v29_v56 = vperm.slane %v20_v18, 2  ;;  %v2076_v59 = vld [vmem:[%s2364_s1 + $0x28] sm:$0x3f] }
  0xb8   :  { %v33_v11 = vmul.f32 %v27_v1, %v2487_v60  ;;  %v1176_v47 = vadd.f32 %v1173_v31, %v1161_v61  ;;  %v34_v24 = vmul.f32 %v28_v38, %v2487_v60  ;;  %v43_v42 = vperm.slane %v1284_v36, 0 }
  0xb9   :  { %v44_v34 = vperm.slane %v1284_v36, 1  ;;  %v1177_v51 = vadd.f32 %v1174_v57, %v1162_v39  ;;  %v1178_v6 = vmax.f32 %v1993_v2, %v1175_v3  ;;  %v35_v45 = vmul.f32 %v29_v56, %v2487_v60  ;;  %v1286_v2 = vld [vmem:[%s2363_s0 + $0x3] ss:$8 sm:$0x7] }
  0xba   :  { %v45_v10 = vperm.slane %v1284_v36, 2  ;;  %v1179_v40 = vmax.f32 %v1999_v50, %v1176_v47  ;;  %v49_v32 = vmul.f32 %v43_v42, %v1792_v12  ;;  %v62_v25 = vperm.slane %v1285_v62, 0 }
  0xbb   :  { %v50_v63 = vmul.f32 %v44_v34, %v1792_v12  ;;  %v1180_v30 = vmax.f32 %v2001_v55, %v1177_v51  ;;  %v1181_v7 = vadd.f32 %v1178_v6, %v2034_v46  ;;  %v63_v19 = vperm.slane %v1285_v62, 1  ;;  %v2057_v55 = vld [vmem:[%s2364_s1 + $0x20] sm:$0x3f] }
  0xbc   :  { %v51_v17 = vmul.f32 %v45_v10, %v1792_v12  ;;  %v1182_v21 = vadd.f32 %v1179_v40, %v2034_v46  ;;  %v52_v22 = vadd.f32 %v49_v32, %v33_v11  ;;  %v64_v53 = vperm.slane %v1285_v62, 2 }
  0xbd   :  { %v53_v50 = vadd.f32 %v50_v63, %v34_v24  ;;  %v1183_v28 = vadd.f32 %v1180_v30, %v2034_v46  ;;  %v1184_v54 = vmul.f32 0.01, %v1181_v7  ;;  %v68_v48 = vmul.f32 %v62_v25, %v2475_v20  ;;  %v1287_v24 = vld [vmem:[%s2363_s0 + $0x4] ss:$8 sm:$0x7] }
  0xbe   :  { %v54_v13 = vadd.f32 %v51_v17, %v35_v45  ;;  %v1185_v58 = vmul.f32 0.01, %v1182_v21  ;;  %v69_v15 = vmul.f32 %v63_v19, %v2475_v20  ;;  %v70_v52 = vmul.f32 %v64_v53, %v2475_v20  ;;  %v1288_v45 = vld [vmem:[%s2363_s0 + $0x5] ss:$8 sm:$0x7] }
  0xbf   :  { %v81_v18 = vperm.slane %v1286_v2, 0  ;;  %v1186_v27 = vmul.f32 0.01, %v1183_v28  ;;  %v1187_v9 = vmax.f32 %v1181_v7, %v1184_v54  ;;  %v71_v37 = vadd.f32 %v68_v48, %v52_v22  ;;  %v1289_v19 = vld [vmem:[%s2363_s0 + $0x6] ss:$8 sm:$0x7] }
  0xc0   :  { %v82_v8 = vperm.slane %v1286_v2, 1  ;;  %v1188_v43 = vmax.f32 %v1182_v21, %v1185_v58  ;;  %v72_v44 = vadd.f32 %v69_v15, %v53_v50  ;;  %v73_v29 = vadd.f32 %v70_v52, %v54_v13  ;;  %v1290_v48 = vld [vmem:[%s2363_s0 + $0x7] ss:$8 sm:$0x7] }
  0xc1   :  { %v83_v41 = vperm.slane %v1286_v2, 2  ;;  %v1189_v1 = vmax.f32 %v1183_v28, %v1186_v27  ;;  %v1207_v36 = vmul.f32 %v1187_v9, %v2052_v35  ;;  %v1190_v61 = vmul.f32 %v1187_v9, %v2064_v23 }
  0xc2   :  { %v87_v39 = vmul.f32 %v81_v18, %v1794_v26  ;;  %v1208_v31 = vmul.f32 %v1188_v43, %v2057_v55  ;;  %v1191_v38 = vmul.f32 %v1188_v43, %v2071_v4  ;;  %v88_v57 = vmul.f32 %v82_v8, %v1794_v26  ;;  %v1291_v43 = vld [vmem:[%s2363_s0 + $0x18] ss:$8 sm:$0x7] }
  0xc3   :  { %v89_v3 = vmul.f32 %v83_v41, %v1794_v26  ;;  %v1209_v56 = vmul.f32 %v1189_v1, %v2076_v59  ;;  %v1210_v11 = vsel %vm609_vm0, %v1207_v36, 0.0  ;;  %v1192_v62 = vmul.f32 %v1189_v1, %v2081_v0 }
  0xc4   :  { %v1193_v47 = vsel %vm609_vm0, %v1190_v61, 0.0  ;;  %v1211_v42 = vsel %vm609_vm0, %v1208_v31, 0.0  ;;  %v1194_v34 = vsel %vm609_vm0, %v1191_v38, 0.0  ;;  %v90_v51 = vadd.f32 %v87_v39, %v71_v37 }
  0xc5   :  { %v91_v6 = vadd.f32 %v88_v57, %v72_v44  ;;  %v1212_v10 = vadd.f32 %v1211_v42, %v1210_v11  ;;  %v1213_v40 = vsel %vm613_vm1, %v1209_v56, 0.0  ;;  %v1195_v32 = vadd.f32 %v1194_v34, %v1193_v47  ;;  %v1292_v11 = vld [vmem:[%s2363_s0 + $0x19] ss:$8 sm:$0x7] }
  0xc6   :  { %v1196_v63 = vsel %vm613_vm1, %v1192_v62, 0.0  ;;  %v92_v25 = vadd.f32 %v89_v3, %v73_v29  ;;  %v100_v30 = vperm.slane %v1287_v24, 0  ;;  %v101_v7 = vperm.slane %v1287_v24, 1 }
  0xc7   :  { %v102_v17 = vperm.slane %v1287_v24, 2  ;;  %v1214_v2 = vadd.f32 %v1213_v40, %v1212_v10  ;;  %v1197_v21 = vadd.f32 %v1196_v63, %v1195_v32  ;;  %v119_v22 = vperm.slane %v1288_v45, 0  ;;  %v1293_v10 = vld [vmem:[%s2363_s0 + $0x1a] ss:$8 sm:$0x7] }
  0xc8   :  { %v120_v50 = vperm.slane %v1288_v45, 1  ;;  %v106_v53 = vmul.f32 %v100_v30, %v2484_v5  ;;  %v107_v28 = vmul.f32 %v101_v7, %v2484_v5  ;;  %v121_v13 = vperm.slane %v1288_v45, 2 }
  0xc9   :  { %v108_v54 = vmul.f32 %v102_v17, %v2484_v5  ;;  %1215 = vadd.xlane.f32.xlu1 %v1214_v2  ;;  %1198 = vadd.xlane.f32.xlu2 %v1197_v21  ;;  %v125_v58 = vmul.f32 %v119_v22, %v2485_v14  ;;  %v138_v52 = vperm.slane %v1289_v19, 0  ;;  %v139_v18 = vperm.slane %v1289_v19, 1  ;;  %v1294_v17 = vld [vmem:[%s2363_s0 + $0x1b] ss:$8 sm:$0x7] }
  0xca   :  { %v126_v15 = vmul.f32 %v120_v50, %v2485_v14  ;;  %v109_v27 = vadd.f32 %v106_v53, %v90_v51  ;;  %v110_v9 = vadd.f32 %v107_v28, %v91_v6  ;;  %v127_v8 = vmul.f32 %v121_v13, %v2485_v14  ;;  %v1295_v50 = vld [vmem:[%s2363_s0 + $0x1c] ss:$8 sm:$0x7] }
  0xcb   :  { %v111_v37 = vadd.f32 %v108_v54, %v92_v25  ;;  %v140_v44 = vperm.slane %v1289_v19, 2  ;;  %v144_v29 = vmul.f32 %v138_v52, %v1851_v49  ;;  %v145_v41 = vmul.f32 %v139_v18, %v1851_v49 }
  0xcc   :  { %v157_v1 = vperm.slane %v1290_v48, 0  ;;  %v128_v36 = vadd.f32 %v125_v58, %v109_v27  ;;  %v129_v61 = vadd.f32 %v126_v15, %v110_v9  ;;  %v158_v31 = vperm.slane %v1290_v48, 1 }
  0xcd   :  { %v130_v39 = vadd.f32 %v127_v8, %v111_v37  ;;  %v146_v38 = vmul.f32 %v140_v44, %v1851_v49  ;;  %v159_v57 = vperm.slane %v1290_v48, 2  ;;  %v176_v56 = vperm.slane %v1291_v43, 0  ;;  %v1296_v8 = vld [vmem:[%s2363_s0 + $0x1d] ss:$8 sm:$0x7] }
  0xce   :  { %v163_v3 = vmul.f32 %v157_v1, %v2486_v33  ;;  %v147_v62 = vadd.f32 %v144_v29, %v128_v36  ;;  %v148_v47 = vadd.f32 %v145_v41, %v129_v61  ;;  %v164_v24 = vmul.f32 %v158_v31, %v2486_v33  ;;  %v1297_v31 = vld [vmem:[%s2363_s0 + $0x1e] ss:$8 sm:$0x7] }
  0xcf   :  { %v177_v42 = vperm.slane %v1291_v43, 1  ;;  %v149_v34 = vadd.f32 %v146_v38, %v130_v39  ;;  %v165_v51 = vmul.f32 %v159_v57, %v2486_v33  ;;  %v178_v6 = vperm.slane %v1291_v43, 2 }
  0xd0   :  { %v182_v45 = vmul.f32 %v176_v56, %v1853_v16  ;;  %v166_v40 = vadd.f32 %v163_v3, %v147_v62  ;;  %v191_v32 = vperm.slane %v1292_v11, 0  ;;  %v2132_v63 = vadd.f32 %v164_v24, %v148_v47 }
  0xd1   :  { %v2135_v25 = vmul.f32 %v177_v42, %v1853_v16  ;;  %v192_v30 = vperm.slane %v1292_v11, 1  ;;  %v193_v7 = vperm.slane %v1292_v11, 2  ;;  %v2140_v19 = vadd.f32 %v165_v51, %v149_v34 }
  0xd2   :  { %v2143_v2 = vmul.f32 %v178_v6, %v1853_v16  ;;  %v2145_v21 = vadd.f32 %v182_v45, %v166_v40  ;;  %v203_v22 = vperm.slane %v1293_v10, 0  ;;  %v197_v53 = vmul.f32 %v191_v32, %v2487_v60  ;;  %v1298_v45 = vld [vmem:[%s2363_s0 + $0x1f] ss:$8 sm:$0x7] }
  0xd3   :  { %v198_v28 = vmul.f32 %v192_v30, %v2487_v60  ;;  %v199_v54 = vmul.f32 %v193_v7, %v2487_v60  ;;  %v204_v13 = vperm.slane %v1293_v10, 1  ;;  %v205_v48 = vperm.slane %v1293_v10, 2 }
  0xd4   :  { %v209_v58 = vmul.f32 %v203_v22, %v1792_v12  ;;  %v218_v15 = vperm.slane %v1294_v17, 0  ;;  %v219_v52 = vperm.slane %v1294_v17, 1  ;;  %v220_v27 = vperm.slane %v1294_v17, 2 }
  0xd5   :  { %v210_v18 = vmul.f32 %v204_v13, %v1792_v12  ;;  %v233_v9 = vperm.slane %v1295_v50, 0  ;;  %v234_v37 = vperm.slane %v1295_v50, 1  ;;  %v211_v43 = vmul.f32 %v205_v48, %v1792_v12 }
  0xd6   :  { %v212_v44 = vadd.f32 %v209_v58, %v197_v53  ;;  %v224_v29 = vmul.f32 %v218_v15, %v2475_v20  ;;  %v225_v41 = vmul.f32 %v219_v52, %v2475_v20  ;;  %v226_v36 = vmul.f32 %v220_v27, %v2475_v20  ;;  %v1299_v53 = vld [vmem:[%s2363_s0 + $0x30] ss:$8 sm:$0x7]  ;;  %v1300_v27 = vld [vmem:[%s2363_s0 + $0x31] ss:$8 sm:$0x7] }
  0xd7   :  { %v213_v1 = vadd.f32 %v210_v18, %v198_v28  ;;  %v235_v61 = vperm.slane %v1295_v50, 2  ;;  %v239_v39 = vmul.f32 %v233_v9, %v1794_v26  ;;  %v214_v38 = vadd.f32 %v211_v43, %v199_v54 }
  0xd8   :  { %v227_v57 = vadd.f32 %v224_v29, %v212_v44  ;;  %v240_v3 = vmul.f32 %v234_v37, %v1794_v26  ;;  %v248_v56 = vperm.slane %v1296_v8, 0  ;;  %v249_v47 = vperm.slane %v1296_v8, 1 }
  0xd9   :  { %v228_v11 = vadd.f32 %v225_v41, %v213_v1  ;;  %v241_v62 = vmul.f32 %v235_v61, %v1794_v26  ;;  %v250_v24 = vperm.slane %v1296_v8, 2  ;;  %v229_v42 = vadd.f32 %v226_v36, %v214_v38  ;;  %v1301_v36 = vld [vmem:[%s2363_s0 + $0x32] ss:$8 sm:$0x7] }
  0xda   :  { %v242_v34 = vadd.f32 %v239_v39, %v227_v57  ;;  %v254_v51 = vmul.f32 %v248_v56, %v2484_v5  ;;  %v263_v6 = vperm.slane %v1297_v31, 0  ;;  %v255_v40 = vmul.f32 %v249_v47, %v2484_v5 }
  0xdb   :  { %v243_v10 = vadd.f32 %v240_v3, %v228_v11  ;;  %v256_v32 = vmul.f32 %v250_v24, %v2484_v5  ;;  %v264_v30 = vperm.slane %v1297_v31, 1  ;;  %v244_v7 = vadd.f32 %v241_v62, %v229_v42 }
  0xdc   :  { %v257_v17 = vadd.f32 %v254_v51, %v242_v34  ;;  %v265_v22 = vperm.slane %v1297_v31, 2  ;;  %v269_v50 = vmul.f32 %v263_v6, %v2485_v14  ;;  %v278_v13 = vperm.slane %v1298_v45, 0  ;;  %v1302_v34 = vld [vmem:[%s2363_s0 + $0x33] ss:$8 sm:$0x7] }
  0xdd   :  { %v258_v28 = vadd.f32 %v255_v40, %v243_v10  ;;  %v270_v54 = vmul.f32 %v264_v30, %v2485_v14  ;;  %v279_v48 = vperm.slane %v1298_v45, 1  ;;  %v259_v58 = vadd.f32 %v256_v32, %v244_v7 }
  0xde   :  { %v271_v15 = vmul.f32 %v265_v22, %v2485_v14  ;;  %v272_v52 = vadd.f32 %v269_v50, %v257_v17  ;;  %v280_v18 = vperm.slane %v1298_v45, 2  ;;  %v284_v37 = vmul.f32 %v278_v13, %v1851_v49  ;;  %v1303_v17 = vld [vmem:[%s2363_s0 + $0x34] ss:$8 sm:$0x7] }
  0xdf   :  { %v273_v9 = vadd.f32 %v270_v54, %v258_v28  ;;  %v285_v8 = vmul.f32 %v279_v48, %v1851_v49  ;;  %v293_v43 = vperm.slane %v1299_v53, 0  ;;  %v294_v41 = vperm.slane %v1299_v53, 1  ;;  %v1304_v48 = vld [vmem:[%s2363_s0 + $0x35] ss:$8 sm:$0x7] }
  0xe0   :  { %v274_v44 = vadd.f32 %v271_v15, %v259_v58  ;;  %v286_v29 = vmul.f32 %v280_v18, %v1851_v49  ;;  %v295_v1 = vperm.slane %v1299_v53, 2  ;;  %v287_v61 = vadd.f32 %v284_v37, %v272_v52  ;;  %v1305_v37 = vld [vmem:[%s2363_s0 + $0x36] ss:$8 sm:$0x7] }
  0xe1   :  { %v288_v39 = vadd.f32 %v285_v8, %v273_v9  ;;  %v299_v31 = vmul.f32 %v293_v43, %v2486_v33  ;;  %v308_v38 = vperm.slane %v1300_v27, 0  ;;  %v300_v3 = vmul.f32 %v294_v41, %v2486_v33 }
  0xe2   :  { %v289_v57 = vadd.f32 %v286_v29, %v274_v44  ;;  %v301_v56 = vmul.f32 %v295_v1, %v2486_v33  ;;  %v309_v11 = vperm.slane %v1300_v27, 1  ;;  %v310_v47 = vperm.slane %v1300_v27, 2 }
  0xe3   :  { %v302_v62 = vadd.f32 %v299_v31, %v287_v61  ;;  %v314_v24 = vmul.f32 %v308_v38, %v1853_v16  ;;  %v326_v42 = vperm.slane %v1301_v36, 0  ;;  %v303_v51 = vadd.f32 %v300_v3, %v288_v39  ;;  %v1306_v3 = vld [vmem:[%s2363_s0 + $0x37] ss:$8 sm:$0x7] }
  0xe4   :  { %v304_v6 = vadd.f32 %v301_v56, %v289_v57  ;;  %v315_v45 = vmul.f32 %v309_v11, %v1853_v16  ;;  %v327_v10 = vperm.slane %v1301_v36, 1  ;;  %v2199_v40 = vadd.f32 %v2135_v25, %v2132_v63 }
  0xe5   :  { %v316_v32 = vmul.f32 %v310_v47, %v1853_v16  ;;  %v2202_v30 = vadd.f32 %v314_v24, %v302_v62  ;;  %v328_v7 = vperm.slane %v1301_v36, 2  ;;  %v2209_v22 = vadd.f32 %v2143_v2, %v2140_v19 }
  0xe6   :  { %v332_v50 = vmul.f32 %v326_v42, %v2487_v60  ;;  %v338_v53 = vperm.slane %v1302_v34, 0  ;;  %v339_v28 = vperm.slane %v1302_v34, 1  ;;  %v2212_v54 = vadd.f32 %v315_v45, %v303_v51 }
  0xe7   :  { %v2214_v63 = vadd.f32 %v316_v32, %v304_v6  ;;  %v333_v25 = vmul.f32 %v327_v10, %v2487_v60  ;;  %v340_v13 = vperm.slane %v1302_v34, 2  ;;  %v320_v58 = vmax.f32 %v2145_v21, %v2202_v30  ;;  %v1307_v6 = vld [vmem:[%s2363_s0 + $0x48] ss:$8 sm:$0x7] }
  0xe8   :  { %v344_v19 = vmul.f32 %v338_v53, %v1792_v12  ;;  %v345_v2 = vmul.f32 %v339_v28, %v1792_v12  ;;  %v353_v15 = vperm.slane %v1303_v17, 0  ;;  %v334_v52 = vmul.f32 %v328_v7, %v2487_v60  ;;  %v1314_v21 = vld [vmem:[%s2363_s0 + $0x4f] ss:$8 sm:$0x7] }
  0xe9   :  { %v346_v18 = vmul.f32 %v340_v13, %v1792_v12  ;;  %v354_v27 = vperm.slane %v1303_v17, 1  ;;  %v355_v9 = vperm.slane %v1303_v17, 2  ;;  %v368_v29 = vperm.slane %v1304_v48, 0 }
  0xea   :  { %v347_v8 = vadd.f32 %v344_v19, %v332_v50  ;;  %v348_v43 = vadd.f32 %v345_v2, %v333_v25  ;;  %v359_v44 = vmul.f32 %v353_v15, %v2475_v20  ;;  %v369_v61 = vperm.slane %v1304_v48, 1  ;;  %v1308_v25 = vld [vmem:[%s2363_s0 + $0x49] ss:$8 sm:$0x7] }
  0xeb   :  { %v349_v41 = vadd.f32 %v346_v18, %v334_v52  ;;  %v360_v1 = vmul.f32 %v354_v27, %v2475_v20  ;;  %v361_v36 = vmul.f32 %v355_v9, %v2475_v20  ;;  %v370_v31 = vperm.slane %v1304_v48, 2  ;;  %v1309_v9 = vld [vmem:[%s2363_s0 + $0x4a] ss:$8 sm:$0x7] }
  0xec   :  { %v362_v39 = vadd.f32 %v359_v44, %v347_v8  ;;  %v374_v38 = vmul.f32 %v368_v29, %v1794_v26  ;;  %v383_v57 = vperm.slane %v1305_v37, 0  ;;  %v375_v62 = vmul.f32 %v369_v61, %v1794_v26 }
  0xed   :  { %v363_v56 = vadd.f32 %v360_v1, %v348_v43  ;;  %v364_v11 = vadd.f32 %v361_v36, %v349_v41  ;;  %v384_v47 = vperm.slane %v1305_v37, 1  ;;  %v376_v24 = vmul.f32 %v370_v31, %v1794_v26 }
  0xee   :  { %v377_v42 = vadd.f32 %v374_v38, %v362_v39  ;;  %v385_v34 = vperm.slane %v1305_v37, 2  ;;  %v389_v51 = vmul.f32 %v383_v57, %v2484_v5  ;;  %v398_v32 = vperm.slane %v1306_v3, 0  ;;  %v1310_v57 = vld [vmem:[%s2363_s0 + $0x4b] ss:$8 sm:$0x7] }
  0xef   :  { %v378_v45 = vadd.f32 %v375_v62, %v363_v56  ;;  %v390_v10 = vmul.f32 %v384_v47, %v2484_v5  ;;  %v399_v7 = vperm.slane %v1306_v3, 1  ;;  %v379_v17 = vadd.f32 %v376_v24, %v364_v11 }
  0xf0   :  { %v391_v50 = vmul.f32 %v385_v34, %v2484_v5  ;;  %v392_v53 = vadd.f32 %v389_v51, %v377_v42  ;;  %v400_v28 = vperm.slane %v1306_v3, 2  ;;  %v404_v48 = vmul.f32 %v398_v32, %v2485_v14  ;;  %v1311_v51 = vld [vmem:[%s2363_s0 + $0x4c] ss:$8 sm:$0x7] }
  0xf1   :  { %v393_v13 = vadd.f32 %v390_v10, %v378_v45  ;;  %v405_v19 = vmul.f32 %v399_v7, %v2485_v14  ;;  %v413_v2 = vperm.slane %v1307_v6, 0  ;;  %v414_v18 = vperm.slane %v1307_v6, 1 }
  0xf2   :  { %v394_v15 = vadd.f32 %v391_v50, %v379_v17  ;;  %v406_v52 = vmul.f32 %v400_v28, %v2485_v14  ;;  %v415_v27 = vperm.slane %v1307_v6, 2  ;;  %v407_v37 = vadd.f32 %v404_v48, %v392_v53  ;;  %v1312_v28 = vld [vmem:[%s2363_s0 + $0x4d] ss:$8 sm:$0x7] }
  0xf3   :  { %v408_v8 = vadd.f32 %v405_v19, %v393_v13  ;;  %v419_v43 = vmul.f32 %v413_v2, %v1851_v49  ;;  %v428_v44 = vperm.slane %v1308_v25, 0  ;;  %v420_v41 = vmul.f32 %v414_v18, %v1851_v49 }
  0xf4   :  { %v409_v29 = vadd.f32 %v406_v52, %v394_v15  ;;  %v421_v1 = vmul.f32 %v415_v27, %v1851_v49  ;;  %v429_v36 = vperm.slane %v1308_v25, 1  ;;  %v430_v39 = vperm.slane %v1308_v25, 2  ;;  %v1313_v27 = vld [vmem:[%s2363_s0 + $0x4e] ss:$8 sm:$0x7] }
  0xf5   :  { %v422_v61 = vadd.f32 %v419_v43, %v407_v37  ;;  %v434_v31 = vmul.f32 %v428_v44, %v2486_v33  ;;  %v443_v38 = vperm.slane %v1309_v9, 0  ;;  %v423_v3 = vadd.f32 %v420_v41, %v408_v8 }
  0xf6   :  { %v424_v56 = vadd.f32 %v421_v1, %v409_v29  ;;  %v435_v11 = vmul.f32 %v429_v36, %v2486_v33  ;;  %v444_v62 = vperm.slane %v1309_v9, 1  ;;  %v436_v47 = vmul.f32 %v430_v39, %v2486_v33 }
  0xf7   :  { %v437_v24 = vadd.f32 %v434_v31, %v422_v61  ;;  %v445_v42 = vperm.slane %v1309_v9, 2  ;;  %v449_v34 = vmul.f32 %v443_v38, %v1853_v16  ;;  %v461_v10 = vperm.slane %v1310_v57, 0 }
  0xf8   :  { %v438_v6 = vadd.f32 %v435_v11, %v423_v3  ;;  %v450_v45 = vmul.f32 %v444_v62, %v1853_v16  ;;  %v462_v32 = vperm.slane %v1310_v57, 1  ;;  %v321_v7 = vmax.f32 %v2199_v40, %v2212_v54 }
  0xf9   :  { %v439_v17 = vadd.f32 %v436_v47, %v424_v56  ;;  %v451_v50 = vmul.f32 %v445_v42, %v1853_v16  ;;  %v463_v53 = vperm.slane %v1310_v57, 2  ;;  %v322_v25 = vmax.f32 %v2209_v22, %v2214_v63 }
  0xfa   :  { %v452_v13 = vadd.f32 %v449_v34, %v437_v24  ;;  %v2275_v48 = vadd.f32 %v450_v45, %v438_v6  ;;  %v473_v19 = vperm.slane %v1311_v51, 0  ;;  %v467_v15 = vmul.f32 %v461_v10, %v2487_v60  ;;  %v1316_v45 = vld [vmem:[%s2363_s0 + $0x61] ss:$8 sm:$0x7] }
  0xfb   :  { %v2277_v2 = vadd.f32 %v451_v50, %v439_v17  ;;  %v468_v52 = vmul.f32 %v462_v32, %v2487_v60  ;;  %v474_v18 = vperm.slane %v1311_v51, 1  ;;  %v475_v37 = vperm.slane %v1311_v51, 2 }
  0xfc   :  { %v2287_v9 = vmax.f32 %v320_v58, %v452_v13  ;;  %v479_v8 = vmul.f32 %v473_v19, %v1792_v12  ;;  %v488_v43 = vperm.slane %v1312_v28, 0  ;;  %v469_v44 = vmul.f32 %v463_v53, %v2487_v60 }
  0xfd   :  { %v480_v29 = vmul.f32 %v474_v18, %v1792_v12  ;;  %v489_v41 = vperm.slane %v1312_v28, 1  ;;  %v490_v1 = vperm.slane %v1312_v28, 2  ;;  %v481_v36 = vmul.f32 %v475_v37, %v1792_v12  ;;  %v1315_v12 = vld [vmem:[%s2363_s0 + $0x60] ss:$8 sm:$0x7] }
  0xfe   :  { %v482_v61 = vadd.f32 %v479_v8, %v467_v15  ;;  %v494_v39 = vmul.f32 %v488_v43, %v2475_v20  ;;  %v503_v31 = vperm.slane %v1313_v27, 0  ;;  %v504_v60 = vperm.slane %v1313_v27, 1 }
  0xff   :  { %v483_v30 = vadd.f32 %v480_v29, %v468_v52  ;;  %v495_v58 = vmul.f32 %v489_v41, %v2475_v20  ;;  %v496_v38 = vmul.f32 %v490_v1, %v2475_v20  ;;  %v484_v57 = vadd.f32 %v481_v36, %v469_v44  ;;  %v1318_v36 = vld [vmem:[%s2363_s0 + $0x63] ss:$8 sm:$0x7] }
 0x100   :  { %v497_v3 = vadd.f32 %v494_v39, %v482_v61  ;;  %v505_v56 = vperm.slane %v1313_v27, 2  ;;  %v509_v11 = vmul.f32 %v503_v31, %v1794_v26  ;;  %v510_v47 = vmul.f32 %v504_v60, %v1794_v26 }
 0x101   :  { %v498_v62 = vadd.f32 %v495_v58, %v483_v30  ;;  %v518_v24 = vperm.slane %v1314_v21, 0  ;;  %v519_v42 = vperm.slane %v1314_v21, 1  ;;  %v499_v34 = vadd.f32 %v496_v38, %v484_v57 }
 0x102   :  { %v511_v51 = vmul.f32 %v505_v56, %v1794_v26  ;;  %v512_v6 = vadd.f32 %v509_v11, %v497_v3  ;;  %v520_v20 = vperm.slane %v1314_v21, 2  ;;  %v533_v50 = vperm.slane %v1315_v12, 0  ;;  %v1317_v26 = vld [vmem:[%s2363_s0 + $0x62] ss:$8 sm:$0x7] }
 0x103   :  { %v513_v10 = vadd.f32 %v510_v47, %v498_v62  ;;  %v524_v32 = vmul.f32 %v518_v24, %v2484_v5  ;;  %v525_v17 = vmul.f32 %v519_v42, %v2484_v5  ;;  %v534_v13 = vperm.slane %v1315_v12, 1 }
 0x104   :  { %v514_v53 = vadd.f32 %v511_v51, %v499_v34  ;;  %v526_v28 = vmul.f32 %v520_v20, %v2484_v5  ;;  %v535_v19 = vperm.slane %v1315_v12, 2  ;;  %v539_v18 = vmul.f32 %v533_v50, %v2485_v14 }
 0x105   :  { %v527_v15 = vadd.f32 %v524_v32, %v512_v6  ;;  %v528_v52 = vadd.f32 %v525_v17, %v513_v10  ;;  %v548_v27 = vperm.slane %v1316_v45, 0  ;;  %v540_v8 = vmul.f32 %v534_v13, %v2485_v14 }
 0x106   :  { %v529_v37 = vadd.f32 %v526_v28, %v514_v53  ;;  %v541_v43 = vmul.f32 %v535_v19, %v2485_v14  ;;  %v549_v44 = vperm.slane %v1316_v45, 1  ;;  %v550_v41 = vperm.slane %v1316_v45, 2 }
 0x107   :  { %v542_v29 = vadd.f32 %v539_v18, %v527_v15  ;;  %v554_v5 = vmul.f32 %v548_v27, %v1851_v49  ;;  %v563_v1 = vperm.slane %v1317_v26, 0  ;;  %v543_v61 = vadd.f32 %v540_v8, %v528_v52 }
 0x108   :  { %v544_v39 = vadd.f32 %v541_v43, %v529_v37  ;;  %v555_v31 = vmul.f32 %v549_v44, %v1851_v49  ;;  %v564_v21 = vperm.slane %v1317_v26, 1  ;;  %v556_v30 = vmul.f32 %v550_v41, %v1851_v49 }
 0x109   :  { %v557_v58 = vadd.f32 %v554_v5, %v542_v29  ;;  %v565_v38 = vperm.slane %v1317_v26, 2  ;;  %v569_v14 = vmul.f32 %v563_v1, %v2486_v33  ;;  %v578_v3 = vperm.slane %v1318_v36, 0 }
 0x10a   :  { %v558_v60 = vadd.f32 %v555_v31, %v543_v61  ;;  %v570_v57 = vmul.f32 %v564_v21, %v2486_v33  ;;  %v579_v56 = vperm.slane %v1318_v36, 1  ;;  %v559_v11 = vadd.f32 %v556_v30, %v544_v39 }
 0x10b   :  { %v571_v12 = vmul.f32 %v565_v38, %v2486_v33  ;;  %v572_v62 = vadd.f32 %v569_v14, %v557_v58  ;;  %v580_v47 = vperm.slane %v1318_v36, 2  ;;  %v456_v24 = vmax.f32 %v321_v7, %v2275_v48 }
 0x10c   :  { %v573_v49 = vadd.f32 %v570_v57, %v558_v60  ;;  %v584_v42 = vmul.f32 %v578_v3, %v1853_v16  ;;  %v585_v34 = vmul.f32 %v579_v56, %v1853_v16  ;;  %v457_v51 = vmax.f32 %v322_v25, %v2277_v2 }
 0x10d   :  { %v574_v6 = vadd.f32 %v571_v12, %v559_v11  ;;  %v586_v33 = vmul.f32 %v580_v47, %v1853_v16 }
 0x10e   :  { %v587_v20 = vadd.f32 %v584_v42, %v572_v62  ;;  %v588_v45 = vadd.f32 %v585_v34, %v573_v49 }
 0x10f   :  { %v589_v10 = vadd.f32 %v586_v33, %v574_v6 }
 0x110   :  { %v590_v32 = vmax.f32 %v2287_v9, %v587_v20  ;;  %v591_v40 = vmax.f32 %v456_v24, %v588_v45  ;;  %v19_v45 = vld [vmem:[%s2364_s1 + $0x36] ss:$0 sm:$0xff] }
 0x111   :  { %v592_v54 = vmax.f32 %v457_v51, %v589_v10 }
 0x112   :  { %v597_v7 = vadd.f32 %v2034_v46, %v590_v32  ;;  %v598_v48 = vadd.f32 %v2034_v46, %v591_v40 }
 0x113   :  { %v599_v17 = vadd.f32 %v2034_v46, %v592_v54 }
 0x114   :  { %v600_v50 = vmul.f32 0.01, %v597_v7  ;;  %v601_v53 = vmul.f32 0.01, %v598_v48 }
 0x115   :  { %v602_v22 = vmul.f32 0.01, %v599_v17 }
 0x116   :  { %v603_v63 = vmax.f32 %v597_v7, %v600_v50  ;;  %v604_v25 = vmax.f32 %v598_v48, %v601_v53 }
 0x117   :  { %v605_v2 = vmax.f32 %v599_v17, %v602_v22 }
 0x118   :  { %v606_v16 = vmul.f32 %v603_v63, %v2064_v23  ;;  %v607_v28 = vmul.f32 %v604_v25, %v2071_v4  ;;  %v625_v9 = vmul.f32 %v603_v63, %v2052_v35  ;;  %v626_v13 = vmul.f32 %v604_v25, %v2057_v55 }
 0x119   :  { %v608_v19 = vmul.f32 %v605_v2, %v2081_v0  ;;  %v627_v26 = vmul.f32 %v605_v2, %v2076_v59 }
 0x11a   :  { %v610_v46 = vsel %vm609_vm0, %v606_v16, 0.0  ;;  %v611_v15 = vsel %vm609_vm0, %v607_v28, 0.0  ;;  %v628_v52 = vsel %vm609_vm0, %v625_v9, 0.0  ;;  %v629_v18 = vsel %vm609_vm0, %v626_v13, 0.0 }
 0x11b   :  { %v612_v27 = vadd.f32 %v611_v15, %v610_v46  ;;  %v630_v23 = vadd.f32 %v629_v18, %v628_v52  ;;  %v614_v4 = vsel %vm613_vm1, %v608_v19, 0.0  ;;  %v631_v35 = vsel %vm613_vm1, %v627_v26, 0.0 }
 0x11d   :  { %v615_v37 = vadd.f32 %v614_v4, %v612_v27  ;;  %v632_v55 = vadd.f32 %v631_v35, %v630_v23 }
 0x11f   :  { %616 = vadd.xlane.f32.xlu0 %v615_v37  ;;  %633 = vadd.xlane.f32.xlu2 %v632_v55 }
 0x13c   :  { %v1216_v0 = vpop.xlane.xlu1 %1215  ;;  %v1199_v59 = vpop.xlane.xlu2 %1198 }
 0x13d   :  { %v1217_v8 = vsel %vm609_vm0, %v1216_v0, 0.0  ;;  %v1200_v43 = vsel %vm609_vm0, %v1199_v59, 0.0 }
 0x13e   :  { %v1218_v44 = vrot.slane %v1217_v8, 4  ;;  %v1201_v29 = vrot.slane %v1200_v43, 4 }
 0x140   :  { %v1219_v41 = vadd.f32 %v1218_v44, %v1217_v8  ;;  %v1202_v5 = vadd.f32 %v1201_v29, %v1200_v43 }
 0x142   :  { %v1220_v1 = vrot.slane %v1219_v41, 2  ;;  %v1203_v36 = vrot.slane %v1202_v5, 2 }
 0x144   :  { %v1221_v61 = vadd.f32 %v1220_v1, %v1219_v41  ;;  %v1204_v39 = vadd.f32 %v1203_v36, %v1202_v5 }
 0x146   :  { %v1222_v38 = vrot.slane %v1221_v61, 1  ;;  %v1205_v14 = vrot.slane %v1204_v39, 1 }
 0x148   :  { %v1223_v11 = vadd.f32 %v1222_v38, %v1221_v61  ;;  %v1206_v12 = vadd.f32 %v1205_v14, %v1204_v39 }
 0x14a   :  { %v1224_v42 = vsel %vm642_vm2, %v1206_v12, %v1223_v11 }
 0x14b   :  { %v1226_v20 = vrot.slane %v1224_v42, 7 }
 0x192   :  { %v617_v31 = vpop.xlane.xlu0 %616  ;;  %v634_v21 = vpop.xlane.xlu2 %633 }
 0x193   :  { %v618_v30 = vsel %vm609_vm0, %v617_v31, 0.0  ;;  %v635_v58 = vsel %vm609_vm0, %v634_v21, 0.0 }
 0x194   :  { %v619_v60 = vrot.slane %v618_v30, 4  ;;  %v636_v57 = vrot.slane %v635_v58, 4 }
 0x196   :  { %v620_v3 = vadd.f32 %v619_v60, %v618_v30  ;;  %v637_v56 = vadd.f32 %v636_v57, %v635_v58 }
 0x198   :  { %v621_v62 = vrot.slane %v620_v3, 2  ;;  %v638_v47 = vrot.slane %v637_v56, 2 }
 0x19a   :  { %v622_v24 = vadd.f32 %v621_v62, %v620_v3  ;;  %v639_v49 = vadd.f32 %v638_v47, %v637_v56 }
 0x19c   :  { %v623_v34 = vrot.slane %v622_v24, 1  ;;  %v640_v51 = vrot.slane %v639_v49, 1 }
 0x19e   :  { %v624_v6 = vadd.f32 %v623_v34, %v622_v24  ;;  %v641_v33 = vadd.f32 %v640_v51, %v639_v49 }
 0x1a0   :  { %v643_v10 = vsel %vm642_vm2, %v624_v6, %v641_v33 }
 0x1a1   :  { %v1229_v32 = vsel %vm1228_vm3, %v643_v10, %v1226_v20 }
 0x1a2   :  { %v1230_v40 = vadd.f32 %v1229_v32, %v19_v45 }
 0x1a4   :  { %1232 = vst.msk [vmem:[#allocation2] sm:$0x3] %vm1231_vm4, %v1230_v40 }
 0x1a5   :  { %1243 = dma.vmem_to_hbm [thread:$0]  %s1239_s29, 32, %s1241_s4, [#allocation3]  }
 0x1a6   :  { %1401 = dma.done.wait [#allocation3], 32  }
 0x1a7   :  { %1402 = vsyncadd [#allocation3], 4294967264 }
 0x1a8   :  { %1248 = vsyncpa [#allocation3], 1 }

</bundles_post_ra>
